<compile_context>
chip_gen: v6e
topology: v6e:2x2x1
jax: 0.10.0
libtpu: 0.0.40
codegen_flags: <defaults>
</compile_context>

<pallas_src>
import math
from functools import partial

import jax
import jax.numpy as jnp
from jax.experimental import pallas as pl
from jax.experimental.pallas import tpu as pltpu


# ----------------------------- in-kernel helpers -----------------------------

def _layernorm(x, w, b, eps=1e-5):
    # PyTorch nn.LayerNorm: biased variance over last dim, eps=1e-5.
    mu = jnp.mean(x, axis=-1, keepdims=True)
    var = jnp.mean(jnp.square(x - mu), axis=-1, keepdims=True)
    return (x - mu) * jax.lax.rsqrt(var + eps) * w + b


def _mm(a_f32, w_bf16):
    # 2-D row-wise matmul: bf16 inputs, f32 accumulation.
    return jnp.dot(a_f32.astype(jnp.bfloat16), w_bf16,
                   preferred_element_type=jnp.float32)


# ------------------------- fused per-batch forward kernel -------------------------
# Post-norm (PyTorch default): x = LN1(x + MHA(x)); x = LN2(x + FFN(x)); logits = x @ Wfc + bfc

def fused_transformer_kernel(nh,
                             src_lane_ref, src_sub_ref, emb_ref, pe_ref,
                             wqkv_ref, bqkv_ref, wo_ref, bo_ref,
                             ln1w_ref, ln1b_ref, w1_ref, b1_ref,
                             w2_ref, b2_ref, ln2w_ref, ln2b_ref,
                             fcw_ref, fcb_ref, out_ref):
    S = src_lane_ref.shape[2]
    V, H = emb_ref.shape
    L = wqkv_ref.shape[0]
    hd = H // nh
    scale = 1.0 / math.sqrt(hd)

    # ---- embedding (one-hot matmul, vocab is tiny) * sqrt(H) + positional encoding ----
    tok_col = src_sub_ref[0]                                             # (S, 1) int32
    onehot = (tok_col == jax.lax.broadcasted_iota(jnp.int32, (S, V), 1)).astype(jnp.float32)
    x = (jnp.dot(onehot, emb_ref[...], preferred_element_type=jnp.float32)
         * math.sqrt(H) + pe_ref[...])                                   # (S, H) f32

    # ---- additive key-padding mask (src == 0), shared across layers & heads ----
    tok_row = src_lane_ref[0]                                            # (1, S) int32
    mask = jnp.where(tok_row == 0, jnp.float32(-1e9),
                     jnp.float32(0.0)).reshape(1, 1, S)                  # (1, 1, S)

    for l in range(L):                      # static unroll over layers
        # -------- multi-head self-attention --------
        # Fused QKV projection, weight-stationary orientation: (3H, H) x (S, H)^T -> (3H, S).
        # Rows of wqkv are PyTorch in_proj_weight (q|k|v, head-major inside each), so the
        # head split below is a pure tile-aligned leading-dim reshape.
        proj = jax.lax.dot_general(
            wqkv_ref[l], x.astype(jnp.bfloat16),
            dimension_numbers=(((1,), (1,)), ((), ())),
            preferred_element_type=jnp.float32) + bqkv_ref[l]            # (3H, S) f32
        r = proj.reshape(3 * nh, hd, S)
        q, k, v = r[0:nh], r[nh:2 * nh], r[2 * nh:3 * nh]                # (nh, hd, S) each

        scores = jax.lax.dot_general(
            q.astype(jnp.bfloat16), k.astype(jnp.bfloat16),
            dimension_numbers=(((1,), (1,)), ((0,), (0,))),
            preferred_element_type=jnp.float32) * scale + mask           # (nh, S, S) f32
        m = jnp.max(scores, axis=-1, keepdims=True)
        p = jnp.exp(scores - m)
        attn = p * pl.reciprocal(jnp.sum(p, axis=-1, keepdims=True), approx=True)

        # attn @ V, produced head-major: (nh, hd, S)
        ctxT = jax.lax.dot_general(
            v.astype(jnp.bfloat16), attn.astype(jnp.bfloat16),
            dimension_numbers=(((2,), (2,)), ((0,), (0,))),
            preferred_element_type=jnp.float32)                          # (nh, hd, S)
        ctx2 = ctxT.reshape(H, S)            # head-concatenated (PyTorch order), token-minor

        # Fused out-projection: ctx2ᵀ @ Wo with contraction dim H (single matmul).
        attn_out = jax.lax.dot_general(
            ctx2.astype(jnp.bfloat16), wo_ref[l],
            dimension_numbers=(((0,), (0,)), ((), ())),
            preferred_element_type=jnp.float32) + bo_ref[l]              # (S, H) f32

        x = _layernorm(x + attn_out, ln1w_ref[l], ln1b_ref[l])

        # -------- feed-forward (dim_feedforward == hidden) --------
        h1 = jnp.maximum(_mm(x, w1_ref[l]) + b1_ref[l], 0.0)
        h2 = _mm(h1, w2_ref[l]) + b2_ref[l]
        x = _layernorm(x + h2, ln2w_ref[l], ln2b_ref[l])

    # -------- fc head (lane-dense, padded to 128 classes; sliced in the wrapper) --------
    out_ref[0] = _mm(x, fcw_ref[...]) + fcb_ref[...]                     # (S, Cpad)


# --------------------------------- glue / setup --------------------------------

def make_positional_encoding(max_len, d_model):
    position = jnp.arange(max_len, dtype=jnp.float32)[:, None]
    div_term = jnp.exp(jnp.arange(0, d_model, 2, dtype=jnp.float32)
                       * (-math.log(10000.0) / d_model))
    pe = jnp.zeros((max_len, d_model), dtype=jnp.float32)
    pe = pe.at[:, 0::2].set(jnp.sin(position * div_term))
    pe = pe.at[:, 1::2].set(jnp.cos(position * div_term))
    return pe  # (max_len, d_model)


def init_params(key, vocab_size, hidden, num_classes, num_layers, num_heads):
    bf16 = jnp.bfloat16
    cpad = ((num_classes + 127) // 128) * 128      # lane-dense fc head

    def w(k, shape, scale=0.02):
        return (scale * jax.random.normal(k, shape)).astype(jnp.float32)

    keys = jax.random.split(key, 2 + num_layers)
    wqkv, wo, w1, w2 = [], [], [], []
    for l in range(num_layers):
        lk = jax.random.split(keys[2 + l], 4)
        wqkv.append(w(lk[0], (3 * hidden, hidden)))   # in_proj_weight (q|k|v rows, head-major)
        wo.append(w(lk[1], (hidden, hidden)))         # out_proj.weight.T
        w1.append(w(lk[2], (hidden, hidden)))         # linear1.weight.T (dim_ff == hidden)
        w2.append(w(lk[3], (hidden, hidden)))         # linear2.weight.T

    fc_w = jnp.zeros((hidden, cpad), jnp.float32)
    fc_w = fc_w.at[:, :num_classes].set(w(keys[1], (hidden, num_classes)))

    L = num_layers
    params = {
        "emb": w(keys[0], (vocab_size, hidden), 1.0),
        "pe": make_positional_encoding(5000, hidden),
        "wqkv": jnp.stack(wqkv).astype(bf16),
        "bqkv": jnp.zeros((L, 3 * hidden, 1), jnp.float32),
        "wo": jnp.stack(wo).astype(bf16),
        "bo": jnp.zeros((L, 1, hidden), jnp.float32),
        "ln1w": jnp.ones((L, 1, hidden), jnp.float32),
        "ln1b": jnp.zeros((L, 1, hidden), jnp.float32),
        "w1": jnp.stack(w1).astype(bf16),
        "b1": jnp.zeros((L, 1, hidden), jnp.float32),
        "w2": jnp.stack(w2).astype(bf16),
        "b2": jnp.zeros((L, 1, hidden), jnp.float32),
        "ln2w": jnp.ones((L, 1, hidden), jnp.float32),
        "ln2b": jnp.zeros((L, 1, hidden), jnp.float32),
        "fc_w": fc_w.astype(bf16),
        "fc_b": jnp.zeros((1, cpad), jnp.float32),
    }
    return params


@partial(jax.jit, static_argnums=(2, 3))
def transformer_forward(src, params, num_heads, num_classes):
    # src: (S, B) int32, seq-first like the PyTorch module; token 0 == padding.
    S, B = src.shape
    cpad = params["fc_w"].shape[1]

    src_t = jnp.transpose(src).astype(jnp.int32)          # (B, S)
    src_lane = src_t[:, None, :]                           # (B, 1, S)  keys along lanes
    src_sub = src_t[:, :, None]                            # (B, S, 1)  tokens along sublanes
    pe_s = jax.lax.slice_in_dim(params["pe"], 0, S, axis=0)  # (S, H)

    kernel_inputs = (src_lane, src_sub, params["emb"], pe_s,
                     params["wqkv"], params["bqkv"], params["wo"], params["bo"],
                     params["ln1w"], params["ln1b"], params["w1"], params["b1"],
                     params["w2"], params["b2"], params["ln2w"], params["ln2b"],
                     params["fc_w"], params["fc_b"])

    def batch_spec(a):
        nd = a.ndim
        return pl.BlockSpec((1,) + a.shape[1:], lambda b: (b,) + (0,) * (nd - 1))

    def full_spec(a):
        nd = a.ndim
        return pl.BlockSpec(a.shape, lambda b: (0,) * nd)

    in_specs = ([batch_spec(src_lane), batch_spec(src_sub)]
                + [full_spec(a) for a in kernel_inputs[2:]])

    out_padded = pl.pallas_call(
        partial(fused_transformer_kernel, num_heads),
        grid=(B,),
        out_shape=jax.ShapeDtypeStruct((B, S, cpad), jnp.float32),
        in_specs=in_specs,
        out_specs=pl.BlockSpec((1, S, cpad), lambda b: (b, 0, 0)),
        compiler_params=pltpu.CompilerParams(
            dimension_semantics=("parallel",),
            vmem_limit_bytes=32 * 1024 * 1024),
    )(*kernel_inputs)

    # Slice off the lane padding and restore the PyTorch (S, B, C) seq-first convention.
    logits = out_padded[:, :, :num_classes]                # (B, S, C)
    return jnp.transpose(logits, (1, 0, 2))                # (S, B, C)


# ------------------------------------ main -------------------------------------

if __name__ == "__main__":
    INPUT_SIZE = 16     # vocab size
    HIDDEN = 32
    NUM_CLASSES = 8
    NUM_LAYERS = 2
    NUM_HEADS = 4
    SEQ, BATCH = 8, 2

    key = jax.random.PRNGKey(0)
    pkey, skey = jax.random.split(key)
    params = init_params(pkey, INPUT_SIZE, HIDDEN, NUM_CLASSES, NUM_LAYERS, NUM_HEADS)

    src = jax.random.randint(skey, (SEQ, BATCH), 0, INPUT_SIZE, dtype=jnp.int32)
    # Guarantee at least one non-padding token per sequence (a fully padded sequence would
    # give a uniform softmax here instead of PyTorch's NaN behavior).
    src = src.at[0].set(jnp.maximum(src[0], 1))

    out = transformer_forward(src, params, NUM_HEADS, NUM_CLASSES)
    jax.block_until_ready(out)
    assert out.shape == (SEQ, BATCH, NUM_CLASSES)
    assert bool(jnp.all(jnp.isfinite(out)))
    print("KERNEL_OK")
</pallas_src>

<mosaic_0001>
module attributes {stable_mosaic.version = 11 : i64} {
  func.func @fused_transformer_kernel(%arg0: i32, %arg1: memref<1x1x8xi32, #tpu.memory_space<vmem>>, %arg2: memref<1x8x1xi32, #tpu.memory_space<vmem>>, %arg3: memref<16x32xf32, #tpu.memory_space<vmem>>, %arg4: memref<8x32xf32, #tpu.memory_space<vmem>>, %arg5: memref<2x96x32xbf16, #tpu.memory_space<vmem>>, %arg6: memref<2x96x1xf32, #tpu.memory_space<vmem>>, %arg7: memref<2x32x32xbf16, #tpu.memory_space<vmem>>, %arg8: memref<2x1x32xf32, #tpu.memory_space<vmem>>, %arg9: memref<2x1x32xf32, #tpu.memory_space<vmem>>, %arg10: memref<2x1x32xf32, #tpu.memory_space<vmem>>, %arg11: memref<2x32x32xbf16, #tpu.memory_space<vmem>>, %arg12: memref<2x1x32xf32, #tpu.memory_space<vmem>>, %arg13: memref<2x32x32xbf16, #tpu.memory_space<vmem>>, %arg14: memref<2x1x32xf32, #tpu.memory_space<vmem>>, %arg15: memref<2x1x32xf32, #tpu.memory_space<vmem>>, %arg16: memref<2x1x32xf32, #tpu.memory_space<vmem>>, %arg17: memref<32x128xbf16, #tpu.memory_space<vmem>>, %arg18: memref<1x128xf32, #tpu.memory_space<vmem>>, %arg19: memref<1x8x128xf32, #tpu.memory_space<vmem>>) attributes {dimension_semantics = [#tpu.dimension_semantics<parallel>], iteration_bounds = array<i64: 2>, scalar_prefetch = 0 : i64, scratch_operands = 0 : i64, tpu.core_type = #tpu.core_type<tc>, window_params = [{transform_indices = @transform_0, window_bounds = array<i64: 1, 1, 8>}, {transform_indices = @transform_1, window_bounds = array<i64: 1, 8, 1>}, {pipeline_mode = #tpu.pipeline_mode<synchronous>, transform_indices = @transform_2, window_bounds = array<i64: 16, 32>}, {pipeline_mode = #tpu.pipeline_mode<synchronous>, transform_indices = @transform_3, window_bounds = array<i64: 8, 32>}, {pipeline_mode = #tpu.pipeline_mode<synchronous>, transform_indices = @transform_4, window_bounds = array<i64: 2, 96, 32>}, {pipeline_mode = #tpu.pipeline_mode<synchronous>, transform_indices = @transform_5, window_bounds = array<i64: 2, 96, 1>}, {pipeline_mode = #tpu.pipeline_mode<synchronous>, transform_indices = @transform_6, window_bounds = array<i64: 2, 32, 32>}, {pipeline_mode = #tpu.pipeline_mode<synchronous>, transform_indices = @transform_7, window_bounds = array<i64: 2, 1, 32>}, {pipeline_mode = #tpu.pipeline_mode<synchronous>, transform_indices = @transform_8, window_bounds = array<i64: 2, 1, 32>}, {pipeline_mode = #tpu.pipeline_mode<synchronous>, transform_indices = @transform_9, window_bounds = array<i64: 2, 1, 32>}, {pipeline_mode = #tpu.pipeline_mode<synchronous>, transform_indices = @transform_10, window_bounds = array<i64: 2, 32, 32>}, {pipeline_mode = #tpu.pipeline_mode<synchronous>, transform_indices = @transform_11, window_bounds = array<i64: 2, 1, 32>}, {pipeline_mode = #tpu.pipeline_mode<synchronous>, transform_indices = @transform_12, window_bounds = array<i64: 2, 32, 32>}, {pipeline_mode = #tpu.pipeline_mode<synchronous>, transform_indices = @transform_13, window_bounds = array<i64: 2, 1, 32>}, {pipeline_mode = #tpu.pipeline_mode<synchronous>, transform_indices = @transform_14, window_bounds = array<i64: 2, 1, 32>}, {pipeline_mode = #tpu.pipeline_mode<synchronous>, transform_indices = @transform_15, window_bounds = array<i64: 2, 1, 32>}, {pipeline_mode = #tpu.pipeline_mode<synchronous>, transform_indices = @transform_16, window_bounds = array<i64: 32, 128>}, {pipeline_mode = #tpu.pipeline_mode<synchronous>, transform_indices = @transform_17, window_bounds = array<i64: 1, 128>}, {transform_indices = @transform_18, window_bounds = array<i64: 1, 8, 128>}]} {
    %c0 = arith.constant 0 : index
    %c0_0 = arith.constant 0 : index
    %c0_1 = arith.constant 0 : index
    %0 = vector.load %arg2[%c0, %c0_0, %c0_1] : memref<1x8x1xi32, #tpu.memory_space<vmem>>, vector<1x8x1xi32>
    %1 = vector.shape_cast %0 : vector<1x8x1xi32> to vector<8x1xi32>
    %2 = tpu.iota {dimensions = array<i32: 1>} : vector<8x16xi32>
    %3 = vector.broadcast %1 : vector<8x1xi32> to vector<8x16xi32>
    %4 = arith.cmpi eq, %3, %2 : vector<8x16xi32>
    %5 = arith.extui %4 : vector<8x16xi1> to vector<8x16xi32>
    %6 = arith.sitofp %5 : vector<8x16xi32> to vector<8x16xf32>
    %c0_2 = arith.constant 0 : index
    %c0_3 = arith.constant 0 : index
    %7 = vector.load %arg3[%c0_2, %c0_3] : memref<16x32xf32, #tpu.memory_space<vmem>>, vector<16x32xf32>
    %cst = arith.constant dense<0.000000e+00> : vector<8x32xf32>
    %8 = tpu.matmul %6, %7, %cst {dimension_numbers = #tpu.dot_dimension_numbers<[1], [0], [0], [1], [0, 0, 1, 1], [], []>} : vector<8x16xf32>, vector<16x32xf32>, vector<8x32xf32> -> vector<8x32xf32>
    %cst_4 = arith.constant 5.65685415 : f32
    %9 = vector.broadcast %cst_4 : f32 to vector<8x32xf32>
    %10 = arith.mulf %8, %9 : vector<8x32xf32>
    %c0_5 = arith.constant 0 : index
    %c0_6 = arith.constant 0 : index
    %11 = vector.load %arg4[%c0_5, %c0_6] : memref<8x32xf32, #tpu.memory_space<vmem>>, vector<8x32xf32>
    %12 = arith.addf %10, %11 : vector<8x32xf32>
    %c0_7 = arith.constant 0 : index
    %c0_8 = arith.constant 0 : index
    %c0_9 = arith.constant 0 : index
    %13 = vector.load %arg1[%c0_7, %c0_8, %c0_9] : memref<1x1x8xi32, #tpu.memory_space<vmem>>, vector<1x1x8xi32>
    %14 = vector.shape_cast %13 : vector<1x1x8xi32> to vector<1x8xi32>
    %c0_i32 = arith.constant 0 : i32
    %15 = vector.broadcast %c0_i32 : i32 to vector<1x8xi32>
    %16 = arith.cmpi eq, %14, %15 : vector<1x8xi32>
    %cst_10 = arith.constant -1.000000e+09 : f32
    %cst_11 = arith.constant 0.000000e+00 : f32
    %17 = vector.broadcast %cst_10 : f32 to vector<1x8xf32>
    %18 = vector.broadcast %cst_11 : f32 to vector<1x8xf32>
    %19 = arith.select %16, %17, %18 : vector<1x8xi1>, vector<1x8xf32>
    %20 = vector.shape_cast %19 : vector<1x8xf32> to vector<1x1x8xf32>
    %c0_12 = arith.constant 0 : index
    %c0_13 = arith.constant 0 : index
    %c0_14 = arith.constant 0 : index
    %21 = vector.load %arg5[%c0_12, %c0_13, %c0_14] : memref<2x96x32xbf16, #tpu.memory_space<vmem>>, vector<1x96x32xbf16>
    %22 = vector.shape_cast %21 : vector<1x96x32xbf16> to vector<96x32xbf16>
    %23 = arith.truncf %12 : vector<8x32xf32> to vector<8x32xbf16>
    %cst_15 = arith.constant dense<0.000000e+00> : vector<96x8xf32>
    %24 = tpu.matmul %22, %23, %cst_15 {dimension_numbers = #tpu.dot_dimension_numbers<[1], [1], [0], [0], [0, 0, 1, 0], [], []>} : vector<96x32xbf16>, vector<8x32xbf16>, vector<96x8xf32> -> vector<96x8xf32>
    %c0_16 = arith.constant 0 : index
    %c0_17 = arith.constant 0 : index
    %c0_18 = arith.constant 0 : index
    %25 = vector.load %arg6[%c0_16, %c0_17, %c0_18] : memref<2x96x1xf32, #tpu.memory_space<vmem>>, vector<1x96x1xf32>
    %26 = vector.shape_cast %25 : vector<1x96x1xf32> to vector<96x1xf32>
    %27 = vector.broadcast %26 : vector<96x1xf32> to vector<96x8xf32>
    %28 = arith.addf %24, %27 : vector<96x8xf32>
    %29 = vector.shape_cast %28 : vector<96x8xf32> to vector<12x8x8xf32>
    %30 = vector.extract_strided_slice %29 {offsets = [0, 0, 0], sizes = [4, 8, 8], strides = [1, 1, 1]} : vector<12x8x8xf32> to vector<4x8x8xf32>
    %31 = vector.extract_strided_slice %29 {offsets = [4, 0, 0], sizes = [4, 8, 8], strides = [1, 1, 1]} : vector<12x8x8xf32> to vector<4x8x8xf32>
    %32 = vector.extract_strided_slice %29 {offsets = [8, 0, 0], sizes = [4, 8, 8], strides = [1, 1, 1]} : vector<12x8x8xf32> to vector<4x8x8xf32>
    %33 = arith.truncf %30 : vector<4x8x8xf32> to vector<4x8x8xbf16>
    %34 = arith.truncf %31 : vector<4x8x8xf32> to vector<4x8x8xbf16>
    %cst_19 = arith.constant dense<0.000000e+00> : vector<4x8x8xf32>
    %35 = tpu.matmul %33, %34, %cst_19 {dimension_numbers = #tpu.dot_dimension_numbers<[1], [1], [2], [2], [0, 0, 0, 2, 1, 2], [0], [0]>} : vector<4x8x8xbf16>, vector<4x8x8xbf16>, vector<4x8x8xf32> -> vector<4x8x8xf32>
    %cst_20 = arith.constant 0.353553385 : f32
    %36 = vector.broadcast %cst_20 : f32 to vector<4x8x8xf32>
    %37 = arith.mulf %35, %36 : vector<4x8x8xf32>
    %38 = vector.broadcast %20 : vector<1x1x8xf32> to vector<4x8x8xf32>
    %39 = arith.addf %37, %38 : vector<4x8x8xf32>
    %cst_21 = arith.constant dense<0xFF800000> : vector<4x8xf32>
    %40 = vector.multi_reduction <maximumf>, %39, %cst_21 [2] : vector<4x8x8xf32> to vector<4x8xf32>
    %41 = vector.shape_cast %40 : vector<4x8xf32> to vector<4x8x1xf32>
    %42 = vector.broadcast %41 : vector<4x8x1xf32> to vector<4x8x8xf32>
    %43 = arith.subf %39, %42 : vector<4x8x8xf32>
    %44 = math.exp %43 : vector<4x8x8xf32>
    %cst_22 = arith.constant dense<0.000000e+00> : vector<4x8xf32>
    %45 = vector.multi_reduction <add>, %44, %cst_22 [2] : vector<4x8x8xf32> to vector<4x8xf32>
    %46 = vector.shape_cast %45 : vector<4x8xf32> to vector<4x8x1xf32>
    %47 = tpu.reciprocal %46 {approx = true} : vector<4x8x1xf32> -> vector<4x8x1xf32>
    %48 = vector.broadcast %47 : vector<4x8x1xf32> to vector<4x8x8xf32>
    %49 = arith.mulf %44, %48 : vector<4x8x8xf32>
    %50 = arith.truncf %32 : vector<4x8x8xf32> to vector<4x8x8xbf16>
    %51 = arith.truncf %49 : vector<4x8x8xf32> to vector<4x8x8xbf16>
    %cst_23 = arith.constant dense<0.000000e+00> : vector<4x8x8xf32>
    %52 = tpu.matmul %50, %51, %cst_23 {dimension_numbers = #tpu.dot_dimension_numbers<[2], [2], [1], [1], [0, 0, 0, 1, 1, 1], [0], [0]>} : vector<4x8x8xbf16>, vector<4x8x8xbf16>, vector<4x8x8xf32> -> vector<4x8x8xf32>
    %53 = vector.shape_cast %52 : vector<4x8x8xf32> to vector<32x8xf32>
    %54 = arith.truncf %53 : vector<32x8xf32> to vector<32x8xbf16>
    %c0_24 = arith.constant 0 : index
    %c0_25 = arith.constant 0 : index
    %c0_26 = arith.constant 0 : index
    %55 = vector.load %arg7[%c0_24, %c0_25, %c0_26] : memref<2x32x32xbf16, #tpu.memory_space<vmem>>, vector<1x32x32xbf16>
    %56 = vector.shape_cast %55 : vector<1x32x32xbf16> to vector<32x32xbf16>
    %cst_27 = arith.constant dense<0.000000e+00> : vector<8x32xf32>
    %57 = tpu.matmul %54, %56, %cst_27 {dimension_numbers = #tpu.dot_dimension_numbers<[0], [0], [1], [1], [0, 1, 1, 1], [], []>} : vector<32x8xbf16>, vector<32x32xbf16>, vector<8x32xf32> -> vector<8x32xf32>
    %c0_28 = arith.constant 0 : index
    %c0_29 = arith.constant 0 : index
    %c0_30 = arith.constant 0 : index
    %58 = vector.load %arg8[%c0_28, %c0_29, %c0_30] : memref<2x1x32xf32, #tpu.memory_space<vmem>>, vector<1x1x32xf32>
    %59 = vector.shape_cast %58 : vector<1x1x32xf32> to vector<1x32xf32>
    %60 = vector.broadcast %59 : vector<1x32xf32> to vector<8x32xf32>
    %61 = arith.addf %57, %60 : vector<8x32xf32>
    %62 = arith.addf %12, %61 : vector<8x32xf32>
    %c0_31 = arith.constant 0 : index
    %c0_32 = arith.constant 0 : index
    %c0_33 = arith.constant 0 : index
    %63 = vector.load %arg9[%c0_31, %c0_32, %c0_33] : memref<2x1x32xf32, #tpu.memory_space<vmem>>, vector<1x1x32xf32>
    %64 = vector.shape_cast %63 : vector<1x1x32xf32> to vector<1x32xf32>
    %c0_34 = arith.constant 0 : index
    %c0_35 = arith.constant 0 : index
    %c0_36 = arith.constant 0 : index
    %65 = vector.load %arg10[%c0_34, %c0_35, %c0_36] : memref<2x1x32xf32, #tpu.memory_space<vmem>>, vector<1x1x32xf32>
    %66 = vector.shape_cast %65 : vector<1x1x32xf32> to vector<1x32xf32>
    %cst_37 = arith.constant dense<0.000000e+00> : vector<8xf32>
    %67 = vector.multi_reduction <add>, %62, %cst_37 [1] : vector<8x32xf32> to vector<8xf32>
    %68 = vector.shape_cast %67 : vector<8xf32> to vector<8x1xf32>
    %cst_38 = arith.constant 3.200000e+01 : f32
    %69 = vector.broadcast %cst_38 : f32 to vector<8x1xf32>
    %70 = arith.divf %68, %69 : vector<8x1xf32>
    %71 = vector.broadcast %70 : vector<8x1xf32> to vector<8x32xf32>
    %72 = arith.subf %62, %71 : vector<8x32xf32>
    %73 = arith.mulf %72, %72 : vector<8x32xf32>
    %cst_39 = arith.constant dense<0.000000e+00> : vector<8xf32>
    %74 = vector.multi_reduction <add>, %73, %cst_39 [1] : vector<8x32xf32> to vector<8xf32>
    %75 = vector.shape_cast %74 : vector<8xf32> to vector<8x1xf32>
    %cst_40 = arith.constant 3.200000e+01 : f32
    %76 = vector.broadcast %cst_40 : f32 to vector<8x1xf32>
    %77 = arith.divf %75, %76 : vector<8x1xf32>
    %78 = vector.broadcast %70 : vector<8x1xf32> to vector<8x32xf32>
    %79 = arith.subf %62, %78 : vector<8x32xf32>
    %cst_41 = arith.constant 9.99999974E-6 : f32
    %80 = vector.broadcast %cst_41 : f32 to vector<8x1xf32>
    %81 = arith.addf %77, %80 : vector<8x1xf32>
    %82 = math.rsqrt %81 : vector<8x1xf32>
    %83 = vector.broadcast %82 : vector<8x1xf32> to vector<8x32xf32>
    %84 = arith.mulf %79, %83 : vector<8x32xf32>
    %85 = vector.broadcast %64 : vector<1x32xf32> to vector<8x32xf32>
    %86 = arith.mulf %84, %85 : vector<8x32xf32>
    %87 = vector.broadcast %66 : vector<1x32xf32> to vector<8x32xf32>
    %88 = arith.addf %86, %87 : vector<8x32xf32>
    %c0_42 = arith.constant 0 : index
    %c0_43 = arith.constant 0 : index
    %c0_44 = arith.constant 0 : index
    %89 = vector.load %arg11[%c0_42, %c0_43, %c0_44] : memref<2x32x32xbf16, #tpu.memory_space<vmem>>, vector<1x32x32xbf16>
    %90 = vector.shape_cast %89 : vector<1x32x32xbf16> to vector<32x32xbf16>
    %91 = arith.truncf %88 : vector<8x32xf32> to vector<8x32xbf16>
    %cst_45 = arith.constant dense<0.000000e+00> : vector<8x32xf32>
    %92 = tpu.matmul %91, %90, %cst_45 {dimension_numbers = #tpu.dot_dimension_numbers<[1], [0], [0], [1], [0, 0, 1, 1], [], []>} : vector<8x32xbf16>, vector<32x32xbf16>, vector<8x32xf32> -> vector<8x32xf32>
    %c0_46 = arith.constant 0 : index
    %c0_47 = arith.constant 0 : index
    %c0_48 = arith.constant 0 : index
    %93 = vector.load %arg12[%c0_46, %c0_47, %c0_48] : memref<2x1x32xf32, #tpu.memory_space<vmem>>, vector<1x1x32xf32>
    %94 = vector.shape_cast %93 : vector<1x1x32xf32> to vector<1x32xf32>
    %95 = vector.broadcast %94 : vector<1x32xf32> to vector<8x32xf32>
    %96 = arith.addf %92, %95 : vector<8x32xf32>
    %cst_49 = arith.constant 0.000000e+00 : f32
    %97 = vector.broadcast %cst_49 : f32 to vector<8x32xf32>
    %98 = arith.maximumf %96, %97 : vector<8x32xf32>
    %c0_50 = arith.constant 0 : index
    %c0_51 = arith.constant 0 : index
    %c0_52 = arith.constant 0 : index
    %99 = vector.load %arg13[%c0_50, %c0_51, %c0_52] : memref<2x32x32xbf16, #tpu.memory_space<vmem>>, vector<1x32x32xbf16>
    %100 = vector.shape_cast %99 : vector<1x32x32xbf16> to vector<32x32xbf16>
    %101 = arith.truncf %98 : vector<8x32xf32> to vector<8x32xbf16>
    %cst_53 = arith.constant dense<0.000000e+00> : vector<8x32xf32>
    %102 = tpu.matmul %101, %100, %cst_53 {dimension_numbers = #tpu.dot_dimension_numbers<[1], [0], [0], [1], [0, 0, 1, 1], [], []>} : vector<8x32xbf16>, vector<32x32xbf16>, vector<8x32xf32> -> vector<8x32xf32>
    %c0_54 = arith.constant 0 : index
    %c0_55 = arith.constant 0 : index
    %c0_56 = arith.constant 0 : index
    %103 = vector.load %arg14[%c0_54, %c0_55, %c0_56] : memref<2x1x32xf32, #tpu.memory_space<vmem>>, vector<1x1x32xf32>
    %104 = vector.shape_cast %103 : vector<1x1x32xf32> to vector<1x32xf32>
    %105 = vector.broadcast %104 : vector<1x32xf32> to vector<8x32xf32>
    %106 = arith.addf %102, %105 : vector<8x32xf32>
    %107 = arith.addf %88, %106 : vector<8x32xf32>
    %c0_57 = arith.constant 0 : index
    %c0_58 = arith.constant 0 : index
    %c0_59 = arith.constant 0 : index
    %108 = vector.load %arg15[%c0_57, %c0_58, %c0_59] : memref<2x1x32xf32, #tpu.memory_space<vmem>>, vector<1x1x32xf32>
    %109 = vector.shape_cast %108 : vector<1x1x32xf32> to vector<1x32xf32>
    %c0_60 = arith.constant 0 : index
    %c0_61 = arith.constant 0 : index
    %c0_62 = arith.constant 0 : index
    %110 = vector.load %arg16[%c0_60, %c0_61, %c0_62] : memref<2x1x32xf32, #tpu.memory_space<vmem>>, vector<1x1x32xf32>
    %111 = vector.shape_cast %110 : vector<1x1x32xf32> to vector<1x32xf32>
    %cst_63 = arith.constant dense<0.000000e+00> : vector<8xf32>
    %112 = vector.multi_reduction <add>, %107, %cst_63 [1] : vector<8x32xf32> to vector<8xf32>
    %113 = vector.shape_cast %112 : vector<8xf32> to vector<8x1xf32>
    %cst_64 = arith.constant 3.200000e+01 : f32
    %114 = vector.broadcast %cst_64 : f32 to vector<8x1xf32>
    %115 = arith.divf %113, %114 : vector<8x1xf32>
    %116 = vector.broadcast %115 : vector<8x1xf32> to vector<8x32xf32>
    %117 = arith.subf %107, %116 : vector<8x32xf32>
    %118 = arith.mulf %117, %117 : vector<8x32xf32>
    %cst_65 = arith.constant dense<0.000000e+00> : vector<8xf32>
    %119 = vector.multi_reduction <add>, %118, %cst_65 [1] : vector<8x32xf32> to vector<8xf32>
    %120 = vector.shape_cast %119 : vector<8xf32> to vector<8x1xf32>
    %cst_66 = arith.constant 3.200000e+01 : f32
    %121 = vector.broadcast %cst_66 : f32 to vector<8x1xf32>
    %122 = arith.divf %120, %121 : vector<8x1xf32>
    %123 = vector.broadcast %115 : vector<8x1xf32> to vector<8x32xf32>
    %124 = arith.subf %107, %123 : vector<8x32xf32>
    %cst_67 = arith.constant 9.99999974E-6 : f32
    %125 = vector.broadcast %cst_67 : f32 to vector<8x1xf32>
    %126 = arith.addf %122, %125 : vector<8x1xf32>
    %127 = math.rsqrt %126 : vector<8x1xf32>
    %128 = vector.broadcast %127 : vector<8x1xf32> to vector<8x32xf32>
    %129 = arith.mulf %124, %128 : vector<8x32xf32>
    %130 = vector.broadcast %109 : vector<1x32xf32> to vector<8x32xf32>
    %131 = arith.mulf %129, %130 : vector<8x32xf32>
    %132 = vector.broadcast %111 : vector<1x32xf32> to vector<8x32xf32>
    %133 = arith.addf %131, %132 : vector<8x32xf32>
    %c1 = arith.constant 1 : index
    %c0_68 = arith.constant 0 : index
    %c0_69 = arith.constant 0 : index
    %134 = vector.load %arg5[%c1, %c0_68, %c0_69] : memref<2x96x32xbf16, #tpu.memory_space<vmem>>, vector<1x96x32xbf16>
    %135 = vector.shape_cast %134 : vector<1x96x32xbf16> to vector<96x32xbf16>
    %136 = arith.truncf %133 : vector<8x32xf32> to vector<8x32xbf16>
    %cst_70 = arith.constant dense<0.000000e+00> : vector<96x8xf32>
    %137 = tpu.matmul %135, %136, %cst_70 {dimension_numbers = #tpu.dot_dimension_numbers<[1], [1], [0], [0], [0, 0, 1, 0], [], []>} : vector<96x32xbf16>, vector<8x32xbf16>, vector<96x8xf32> -> vector<96x8xf32>
    %c1_71 = arith.constant 1 : index
    %c0_72 = arith.constant 0 : index
    %c0_73 = arith.constant 0 : index
    %138 = vector.load %arg6[%c1_71, %c0_72, %c0_73] : memref<2x96x1xf32, #tpu.memory_space<vmem>>, vector<1x96x1xf32>
    %139 = vector.shape_cast %138 : vector<1x96x1xf32> to vector<96x1xf32>
    %140 = vector.broadcast %139 : vector<96x1xf32> to vector<96x8xf32>
    %141 = arith.addf %137, %140 : vector<96x8xf32>
    %142 = vector.shape_cast %141 : vector<96x8xf32> to vector<12x8x8xf32>
    %143 = vector.extract_strided_slice %142 {offsets = [0, 0, 0], sizes = [4, 8, 8], strides = [1, 1, 1]} : vector<12x8x8xf32> to vector<4x8x8xf32>
    %144 = vector.extract_strided_slice %142 {offsets = [4, 0, 0], sizes = [4, 8, 8], strides = [1, 1, 1]} : vector<12x8x8xf32> to vector<4x8x8xf32>
    %145 = vector.extract_strided_slice %142 {offsets = [8, 0, 0], sizes = [4, 8, 8], strides = [1, 1, 1]} : vector<12x8x8xf32> to vector<4x8x8xf32>
    %146 = arith.truncf %143 : vector<4x8x8xf32> to vector<4x8x8xbf16>
    %147 = arith.truncf %144 : vector<4x8x8xf32> to vector<4x8x8xbf16>
    %cst_74 = arith.constant dense<0.000000e+00> : vector<4x8x8xf32>
    %148 = tpu.matmul %146, %147, %cst_74 {dimension_numbers = #tpu.dot_dimension_numbers<[1], [1], [2], [2], [0, 0, 0, 2, 1, 2], [0], [0]>} : vector<4x8x8xbf16>, vector<4x8x8xbf16>, vector<4x8x8xf32> -> vector<4x8x8xf32>
    %cst_75 = arith.constant 0.353553385 : f32
    %149 = vector.broadcast %cst_75 : f32 to vector<4x8x8xf32>
    %150 = arith.mulf %148, %149 : vector<4x8x8xf32>
    %151 = vector.broadcast %20 : vector<1x1x8xf32> to vector<4x8x8xf32>
    %152 = arith.addf %150, %151 : vector<4x8x8xf32>
    %cst_76 = arith.constant dense<0xFF800000> : vector<4x8xf32>
    %153 = vector.multi_reduction <maximumf>, %152, %cst_76 [2] : vector<4x8x8xf32> to vector<4x8xf32>
    %154 = vector.shape_cast %153 : vector<4x8xf32> to vector<4x8x1xf32>
    %155 = vector.broadcast %154 : vector<4x8x1xf32> to vector<4x8x8xf32>
    %156 = arith.subf %152, %155 : vector<4x8x8xf32>
    %157 = math.exp %156 : vector<4x8x8xf32>
    %cst_77 = arith.constant dense<0.000000e+00> : vector<4x8xf32>
    %158 = vector.multi_reduction <add>, %157, %cst_77 [2] : vector<4x8x8xf32> to vector<4x8xf32>
    %159 = vector.shape_cast %158 : vector<4x8xf32> to vector<4x8x1xf32>
    %160 = tpu.reciprocal %159 {approx = true} : vector<4x8x1xf32> -> vector<4x8x1xf32>
    %161 = vector.broadcast %160 : vector<4x8x1xf32> to vector<4x8x8xf32>
    %162 = arith.mulf %157, %161 : vector<4x8x8xf32>
    %163 = arith.truncf %145 : vector<4x8x8xf32> to vector<4x8x8xbf16>
    %164 = arith.truncf %162 : vector<4x8x8xf32> to vector<4x8x8xbf16>
    %cst_78 = arith.constant dense<0.000000e+00> : vector<4x8x8xf32>
    %165 = tpu.matmul %163, %164, %cst_78 {dimension_numbers = #tpu.dot_dimension_numbers<[2], [2], [1], [1], [0, 0, 0, 1, 1, 1], [0], [0]>} : vector<4x8x8xbf16>, vector<4x8x8xbf16>, vector<4x8x8xf32> -> vector<4x8x8xf32>
    %166 = vector.shape_cast %165 : vector<4x8x8xf32> to vector<32x8xf32>
    %167 = arith.truncf %166 : vector<32x8xf32> to vector<32x8xbf16>
    %c1_79 = arith.constant 1 : index
    %c0_80 = arith.constant 0 : index
    %c0_81 = arith.constant 0 : index
    %168 = vector.load %arg7[%c1_79, %c0_80, %c0_81] : memref<2x32x32xbf16, #tpu.memory_space<vmem>>, vector<1x32x32xbf16>
    %169 = vector.shape_cast %168 : vector<1x32x32xbf16> to vector<32x32xbf16>
    %cst_82 = arith.constant dense<0.000000e+00> : vector<8x32xf32>
    %170 = tpu.matmul %167, %169, %cst_82 {dimension_numbers = #tpu.dot_dimension_numbers<[0], [0], [1], [1], [0, 1, 1, 1], [], []>} : vector<32x8xbf16>, vector<32x32xbf16>, vector<8x32xf32> -> vector<8x32xf32>
    %c1_83 = arith.constant 1 : index
    %c0_84 = arith.constant 0 : index
    %c0_85 = arith.constant 0 : index
    %171 = vector.load %arg8[%c1_83, %c0_84, %c0_85] : memref<2x1x32xf32, #tpu.memory_space<vmem>>, vector<1x1x32xf32>
    %172 = vector.shape_cast %171 : vector<1x1x32xf32> to vector<1x32xf32>
    %173 = vector.broadcast %172 : vector<1x32xf32> to vector<8x32xf32>
    %174 = arith.addf %170, %173 : vector<8x32xf32>
    %175 = arith.addf %133, %174 : vector<8x32xf32>
    %c1_86 = arith.constant 1 : index
    %c0_87 = arith.constant 0 : index
    %c0_88 = arith.constant 0 : index
    %176 = vector.load %arg9[%c1_86, %c0_87, %c0_88] : memref<2x1x32xf32, #tpu.memory_space<vmem>>, vector<1x1x32xf32>
    %177 = vector.shape_cast %176 : vector<1x1x32xf32> to vector<1x32xf32>
    %c1_89 = arith.constant 1 : index
    %c0_90 = arith.constant 0 : index
    %c0_91 = arith.constant 0 : index
    %178 = vector.load %arg10[%c1_89, %c0_90, %c0_91] : memref<2x1x32xf32, #tpu.memory_space<vmem>>, vector<1x1x32xf32>
    %179 = vector.shape_cast %178 : vector<1x1x32xf32> to vector<1x32xf32>
    %cst_92 = arith.constant dense<0.000000e+00> : vector<8xf32>
    %180 = vector.multi_reduction <add>, %175, %cst_92 [1] : vector<8x32xf32> to vector<8xf32>
    %181 = vector.shape_cast %180 : vector<8xf32> to vector<8x1xf32>
    %cst_93 = arith.constant 3.200000e+01 : f32
    %182 = vector.broadcast %cst_93 : f32 to vector<8x1xf32>
    %183 = arith.divf %181, %182 : vector<8x1xf32>
    %184 = vector.broadcast %183 : vector<8x1xf32> to vector<8x32xf32>
    %185 = arith.subf %175, %184 : vector<8x32xf32>
    %186 = arith.mulf %185, %185 : vector<8x32xf32>
    %cst_94 = arith.constant dense<0.000000e+00> : vector<8xf32>
    %187 = vector.multi_reduction <add>, %186, %cst_94 [1] : vector<8x32xf32> to vector<8xf32>
    %188 = vector.shape_cast %187 : vector<8xf32> to vector<8x1xf32>
    %cst_95 = arith.constant 3.200000e+01 : f32
    %189 = vector.broadcast %cst_95 : f32 to vector<8x1xf32>
    %190 = arith.divf %188, %189 : vector<8x1xf32>
    %191 = vector.broadcast %183 : vector<8x1xf32> to vector<8x32xf32>
    %192 = arith.subf %175, %191 : vector<8x32xf32>
    %cst_96 = arith.constant 9.99999974E-6 : f32
    %193 = vector.broadcast %cst_96 : f32 to vector<8x1xf32>
    %194 = arith.addf %190, %193 : vector<8x1xf32>
    %195 = math.rsqrt %194 : vector<8x1xf32>
    %196 = vector.broadcast %195 : vector<8x1xf32> to vector<8x32xf32>
    %197 = arith.mulf %192, %196 : vector<8x32xf32>
    %198 = vector.broadcast %177 : vector<1x32xf32> to vector<8x32xf32>
    %199 = arith.mulf %197, %198 : vector<8x32xf32>
    %200 = vector.broadcast %179 : vector<1x32xf32> to vector<8x32xf32>
    %201 = arith.addf %199, %200 : vector<8x32xf32>
    %c1_97 = arith.constant 1 : index
    %c0_98 = arith.constant 0 : index
    %c0_99 = arith.constant 0 : index
    %202 = vector.load %arg11[%c1_97, %c0_98, %c0_99] : memref<2x32x32xbf16, #tpu.memory_space<vmem>>, vector<1x32x32xbf16>
    %203 = vector.shape_cast %202 : vector<1x32x32xbf16> to vector<32x32xbf16>
    %204 = arith.truncf %201 : vector<8x32xf32> to vector<8x32xbf16>
    %cst_100 = arith.constant dense<0.000000e+00> : vector<8x32xf32>
    %205 = tpu.matmul %204, %203, %cst_100 {dimension_numbers = #tpu.dot_dimension_numbers<[1], [0], [0], [1], [0, 0, 1, 1], [], []>} : vector<8x32xbf16>, vector<32x32xbf16>, vector<8x32xf32> -> vector<8x32xf32>
    %c1_101 = arith.constant 1 : index
    %c0_102 = arith.constant 0 : index
    %c0_103 = arith.constant 0 : index
    %206 = vector.load %arg12[%c1_101, %c0_102, %c0_103] : memref<2x1x32xf32, #tpu.memory_space<vmem>>, vector<1x1x32xf32>
    %207 = vector.shape_cast %206 : vector<1x1x32xf32> to vector<1x32xf32>
    %208 = vector.broadcast %207 : vector<1x32xf32> to vector<8x32xf32>
    %209 = arith.addf %205, %208 : vector<8x32xf32>
    %cst_104 = arith.constant 0.000000e+00 : f32
    %210 = vector.broadcast %cst_104 : f32 to vector<8x32xf32>
    %211 = arith.maximumf %209, %210 : vector<8x32xf32>
    %c1_105 = arith.constant 1 : index
    %c0_106 = arith.constant 0 : index
    %c0_107 = arith.constant 0 : index
    %212 = vector.load %arg13[%c1_105, %c0_106, %c0_107] : memref<2x32x32xbf16, #tpu.memory_space<vmem>>, vector<1x32x32xbf16>
    %213 = vector.shape_cast %212 : vector<1x32x32xbf16> to vector<32x32xbf16>
    %214 = arith.truncf %211 : vector<8x32xf32> to vector<8x32xbf16>
    %cst_108 = arith.constant dense<0.000000e+00> : vector<8x32xf32>
    %215 = tpu.matmul %214, %213, %cst_108 {dimension_numbers = #tpu.dot_dimension_numbers<[1], [0], [0], [1], [0, 0, 1, 1], [], []>} : vector<8x32xbf16>, vector<32x32xbf16>, vector<8x32xf32> -> vector<8x32xf32>
    %c1_109 = arith.constant 1 : index
    %c0_110 = arith.constant 0 : index
    %c0_111 = arith.constant 0 : index
    %216 = vector.load %arg14[%c1_109, %c0_110, %c0_111] : memref<2x1x32xf32, #tpu.memory_space<vmem>>, vector<1x1x32xf32>
    %217 = vector.shape_cast %216 : vector<1x1x32xf32> to vector<1x32xf32>
    %218 = vector.broadcast %217 : vector<1x32xf32> to vector<8x32xf32>
    %219 = arith.addf %215, %218 : vector<8x32xf32>
    %220 = arith.addf %201, %219 : vector<8x32xf32>
    %c1_112 = arith.constant 1 : index
    %c0_113 = arith.constant 0 : index
    %c0_114 = arith.constant 0 : index
    %221 = vector.load %arg15[%c1_112, %c0_113, %c0_114] : memref<2x1x32xf32, #tpu.memory_space<vmem>>, vector<1x1x32xf32>
    %222 = vector.shape_cast %221 : vector<1x1x32xf32> to vector<1x32xf32>
    %c1_115 = arith.constant 1 : index
    %c0_116 = arith.constant 0 : index
    %c0_117 = arith.constant 0 : index
    %223 = vector.load %arg16[%c1_115, %c0_116, %c0_117] : memref<2x1x32xf32, #tpu.memory_space<vmem>>, vector<1x1x32xf32>
    %224 = vector.shape_cast %223 : vector<1x1x32xf32> to vector<1x32xf32>
    %cst_118 = arith.constant dense<0.000000e+00> : vector<8xf32>
    %225 = vector.multi_reduction <add>, %220, %cst_118 [1] : vector<8x32xf32> to vector<8xf32>
    %226 = vector.shape_cast %225 : vector<8xf32> to vector<8x1xf32>
    %cst_119 = arith.constant 3.200000e+01 : f32
    %227 = vector.broadcast %cst_119 : f32 to vector<8x1xf32>
    %228 = arith.divf %226, %227 : vector<8x1xf32>
    %229 = vector.broadcast %228 : vector<8x1xf32> to vector<8x32xf32>
    %230 = arith.subf %220, %229 : vector<8x32xf32>
    %231 = arith.mulf %230, %230 : vector<8x32xf32>
    %cst_120 = arith.constant dense<0.000000e+00> : vector<8xf32>
    %232 = vector.multi_reduction <add>, %231, %cst_120 [1] : vector<8x32xf32> to vector<8xf32>
    %233 = vector.shape_cast %232 : vector<8xf32> to vector<8x1xf32>
    %cst_121 = arith.constant 3.200000e+01 : f32
    %234 = vector.broadcast %cst_121 : f32 to vector<8x1xf32>
    %235 = arith.divf %233, %234 : vector<8x1xf32>
    %236 = vector.broadcast %228 : vector<8x1xf32> to vector<8x32xf32>
    %237 = arith.subf %220, %236 : vector<8x32xf32>
    %cst_122 = arith.constant 9.99999974E-6 : f32
    %238 = vector.broadcast %cst_122 : f32 to vector<8x1xf32>
    %239 = arith.addf %235, %238 : vector<8x1xf32>
    %240 = math.rsqrt %239 : vector<8x1xf32>
    %241 = vector.broadcast %240 : vector<8x1xf32> to vector<8x32xf32>
    %242 = arith.mulf %237, %241 : vector<8x32xf32>
    %243 = vector.broadcast %222 : vector<1x32xf32> to vector<8x32xf32>
    %244 = arith.mulf %242, %243 : vector<8x32xf32>
    %245 = vector.broadcast %224 : vector<1x32xf32> to vector<8x32xf32>
    %246 = arith.addf %244, %245 : vector<8x32xf32>
    %c0_123 = arith.constant 0 : index
    %c0_124 = arith.constant 0 : index
    %247 = vector.load %arg17[%c0_123, %c0_124] : memref<32x128xbf16, #tpu.memory_space<vmem>>, vector<32x128xbf16>
    %248 = arith.truncf %246 : vector<8x32xf32> to vector<8x32xbf16>
    %cst_125 = arith.constant dense<0.000000e+00> : vector<8x128xf32>
    %249 = tpu.matmul %248, %247, %cst_125 {dimension_numbers = #tpu.dot_dimension_numbers<[1], [0], [0], [1], [0, 0, 1, 1], [], []>} : vector<8x32xbf16>, vector<32x128xbf16>, vector<8x128xf32> -> vector<8x128xf32>
    %c0_126 = arith.constant 0 : index
    %c0_127 = arith.constant 0 : index
    %250 = vector.load %arg18[%c0_126, %c0_127] : memref<1x128xf32, #tpu.memory_space<vmem>>, vector<1x128xf32>
    %251 = vector.broadcast %250 : vector<1x128xf32> to vector<8x128xf32>
    %252 = arith.addf %249, %251 : vector<8x128xf32>
    %c0_128 = arith.constant 0 : index
    %c0_129 = arith.constant 0 : index
    %c0_130 = arith.constant 0 : index
    %253 = vector.load %arg19[%c0_128, %c0_129, %c0_130] : memref<1x8x128xf32, #tpu.memory_space<vmem>>, vector<1x8x128xf32>
    %254 = vector.shape_cast %253 : vector<1x8x128xf32> to vector<8x128xf32>
    %255 = vector.shape_cast %252 : vector<8x128xf32> to vector<1x8x128xf32>
    tpu.vector_store %arg19[%c0_128, %c0_129, %c0_130], %255 {strides = array<i32>} : memref<1x8x128xf32, #tpu.memory_space<vmem>>, vector<1x8x128xf32>,
    return
  }
  func.func @transform_0(%arg0: i32) -> (i32, i32, i32) {
    %c0_i32 = arith.constant 0 : i32
    %c0_i32_0 = arith.constant 0 : i32
    %c0_i32_1 = arith.constant 0 : i32
    return %arg0, %c0_i32, %c0_i32_0 : i32, i32, i32
  }
  func.func @transform_1(%arg0: i32) -> (i32, i32, i32) {
    %c0_i32 = arith.constant 0 : i32
    %c0_i32_0 = arith.constant 0 : i32
    %c0_i32_1 = arith.constant 0 : i32
    return %arg0, %c0_i32, %c0_i32_0 : i32, i32, i32
  }
  func.func @transform_2(%arg0: i32) -> (i32, i32) {
    %c0_i32 = arith.constant 0 : i32
    %c0_i32_0 = arith.constant 0 : i32
    %c0_i32_1 = arith.constant 0 : i32
    return %c0_i32, %c0_i32_0 : i32, i32
  }
  func.func @transform_3(%arg0: i32) -> (i32, i32) {
    %c0_i32 = arith.constant 0 : i32
    %c0_i32_0 = arith.constant 0 : i32
    %c0_i32_1 = arith.constant 0 : i32
    return %c0_i32, %c0_i32_0 : i32, i32
  }
  func.func @transform_4(%arg0: i32) -> (i32, i32, i32) {
    %c0_i32 = arith.constant 0 : i32
    %c0_i32_0 = arith.constant 0 : i32
    %c0_i32_1 = arith.constant 0 : i32
    %c0_i32_2 = arith.constant 0 : i32
    return %c0_i32, %c0_i32_0, %c0_i32_1 : i32, i32, i32
  }
  func.func @transform_5(%arg0: i32) -> (i32, i32, i32) {
    %c0_i32 = arith.constant 0 : i32
    %c0_i32_0 = arith.constant 0 : i32
    %c0_i32_1 = arith.constant 0 : i32
    %c0_i32_2 = arith.constant 0 : i32
    return %c0_i32, %c0_i32_0, %c0_i32_1 : i32, i32, i32
  }
  func.func @transform_6(%arg0: i32) -> (i32, i32, i32) {
    %c0_i32 = arith.constant 0 : i32
    %c0_i32_0 = arith.constant 0 : i32
    %c0_i32_1 = arith.constant 0 : i32
    %c0_i32_2 = arith.constant 0 : i32
    return %c0_i32, %c0_i32_0, %c0_i32_1 : i32, i32, i32
  }
  func.func @transform_7(%arg0: i32) -> (i32, i32, i32) {
    %c0_i32 = arith.constant 0 : i32
    %c0_i32_0 = arith.constant 0 : i32
    %c0_i32_1 = arith.constant 0 : i32
    %c0_i32_2 = arith.constant 0 : i32
    return %c0_i32, %c0_i32_0, %c0_i32_1 : i32, i32, i32
  }
  func.func @transform_8(%arg0: i32) -> (i32, i32, i32) {
    %c0_i32 = arith.constant 0 : i32
    %c0_i32_0 = arith.constant 0 : i32
    %c0_i32_1 = arith.constant 0 : i32
    %c0_i32_2 = arith.constant 0 : i32
    return %c0_i32, %c0_i32_0, %c0_i32_1 : i32, i32, i32
  }
  func.func @transform_9(%arg0: i32) -> (i32, i32, i32) {
    %c0_i32 = arith.constant 0 : i32
    %c0_i32_0 = arith.constant 0 : i32
    %c0_i32_1 = arith.constant 0 : i32
    %c0_i32_2 = arith.constant 0 : i32
    return %c0_i32, %c0_i32_0, %c0_i32_1 : i32, i32, i32
  }
  func.func @transform_10(%arg0: i32) -> (i32, i32, i32) {
    %c0_i32 = arith.constant 0 : i32
    %c0_i32_0 = arith.constant 0 : i32
    %c0_i32_1 = arith.constant 0 : i32
    %c0_i32_2 = arith.constant 0 : i32
    return %c0_i32, %c0_i32_0, %c0_i32_1 : i32, i32, i32
  }
  func.func @transform_11(%arg0: i32) -> (i32, i32, i32) {
    %c0_i32 = arith.constant 0 : i32
    %c0_i32_0 = arith.constant 0 : i32
    %c0_i32_1 = arith.constant 0 : i32
    %c0_i32_2 = arith.constant 0 : i32
    return %c0_i32, %c0_i32_0, %c0_i32_1 : i32, i32, i32
  }
  func.func @transform_12(%arg0: i32) -> (i32, i32, i32) {
    %c0_i32 = arith.constant 0 : i32
    %c0_i32_0 = arith.constant 0 : i32
    %c0_i32_1 = arith.constant 0 : i32
    %c0_i32_2 = arith.constant 0 : i32
    return %c0_i32, %c0_i32_0, %c0_i32_1 : i32, i32, i32
  }
  func.func @transform_13(%arg0: i32) -> (i32, i32, i32) {
    %c0_i32 = arith.constant 0 : i32
    %c0_i32_0 = arith.constant 0 : i32
    %c0_i32_1 = arith.constant 0 : i32
    %c0_i32_2 = arith.constant 0 : i32
    return %c0_i32, %c0_i32_0, %c0_i32_1 : i32, i32, i32
  }
  func.func @transform_14(%arg0: i32) -> (i32, i32, i32) {
    %c0_i32 = arith.constant 0 : i32
    %c0_i32_0 = arith.constant 0 : i32
    %c0_i32_1 = arith.constant 0 : i32
    %c0_i32_2 = arith.constant 0 : i32
    return %c0_i32, %c0_i32_0, %c0_i32_1 : i32, i32, i32
  }
  func.func @transform_15(%arg0: i32) -> (i32, i32, i32) {
    %c0_i32 = arith.constant 0 : i32
    %c0_i32_0 = arith.constant 0 : i32
    %c0_i32_1 = arith.constant 0 : i32
    %c0_i32_2 = arith.constant 0 : i32
    return %c0_i32, %c0_i32_0, %c0_i32_1 : i32, i32, i32
  }
  func.func @transform_16(%arg0: i32) -> (i32, i32) {
    %c0_i32 = arith.constant 0 : i32
    %c0_i32_0 = arith.constant 0 : i32
    %c0_i32_1 = arith.constant 0 : i32
    return %c0_i32, %c0_i32_0 : i32, i32
  }
  func.func @transform_17(%arg0: i32) -> (i32, i32) {
    %c0_i32 = arith.constant 0 : i32
    %c0_i32_0 = arith.constant 0 : i32
    %c0_i32_1 = arith.constant 0 : i32
    return %c0_i32, %c0_i32_0 : i32, i32
  }
  func.func @transform_18(%arg0: i32) -> (i32, i32, i32) {
    %c0_i32 = arith.constant 0 : i32
    %c0_i32_0 = arith.constant 0 : i32
    %c0_i32_1 = arith.constant 0 : i32
    return %arg0, %c0_i32, %c0_i32_0 : i32, i32, i32
  }
}

</mosaic_0001>

<bundles_post_ra>
// kernel: transformer_forward.1
= control target key start
LH: loop header
LB: loop body
LE: loop exit
PB: predicated region body
PF: predicated region fallthrough
CT: control target
= control target key end

     0   :  { %s3395_s27 = smov 0   ;;  %s3820_s0 = inlined_call_operand.vmem [shape: s32[2,1,8], index: 0, kind: input, shape index: {}]   ;;  %s3821_s1 = inlined_call_operand.vmem [shape: s32[2,8,1], index: 1, kind: input, shape index: {}]   ;;  %s3822_s2 = inlined_call_operand.vmem [shape: f32[16,32], index: 2, kind: input, shape index: {}]   ;;  %s3823_s3 = inlined_call_operand.vmem [shape: f32[8,32], index: 3, kind: input, shape index: {}]   ;;  %s3824_s4 = inlined_call_operand.vmem [shape: bf16[2,96,32], index: 4, kind: input, shape index: {}]   ;;  %s3825_s5 = inlined_call_operand.vmem [shape: f32[2,96,1], index: 5, kind: input, shape index: {}]   ;;  %s3826_s6 = inlined_call_operand.vmem [shape: bf16[2,32,32], index: 6, kind: input, shape index: {}]   ;;  %s3827_s7 = inlined_call_operand.vmem [shape: f32[2,1,32], index: 7, kind: input, shape index: {}]   ;;  %s3828_s8 = inlined_call_operand.vmem [shape: f32[2,1,32], index: 8, kind: input, shape index: {}]   ;;  %s3829_s9 = inlined_call_operand.vmem [shape: f32[2,1,32], index: 9, kind: input, shape index: {}]   ;;  %s3830_s10 = inlined_call_operand.vmem [shape: bf16[2,32,32], index: 10, kind: input, shape index: {}]   ;;  %s3831_s11 = inlined_call_operand.vmem [shape: f32[2,1,32], index: 11, kind: input, shape index: {}]   ;;  %s3832_s12 = inlined_call_operand.vmem [shape: bf16[2,32,32], index: 12, kind: input, shape index: {}]   ;;  %s3833_s13 = inlined_call_operand.vmem [shape: f32[2,1,32], index: 13, kind: input, shape index: {}]   ;;  %s3834_s14 = inlined_call_operand.vmem [shape: f32[2,1,32], index: 14, kind: input, shape index: {}]   ;;  %s3835_s15 = inlined_call_operand.vmem [shape: f32[2,1,32], index: 15, kind: input, shape index: {}]   ;;  %s3836_s16 = inlined_call_operand.vmem [shape: bf16[32,128], index: 16, kind: input, shape index: {}]   ;;  %s3837_s17 = inlined_call_operand.vmem [shape: f32[1,128], index: 17, kind: input, shape index: {}]   ;;  %s3838_s18 = inlined_call_operand.vmem [shape: f32[2,8,128], index: 18, kind: output, shape index: {}]  }
   0x1   :  { %3840 = sst [smem:[#allocation2_spill]] %s3820_s0 }
   0x2   :  { %3841 = sst [smem:[#allocation3_spill]] %s3821_s1 }
   0x3   :  { %3842 = sst [smem:[#allocation4_spill]] %s3822_s2 }
   0x4 LB: > { %s2821_s28 = sadd.s32 4294967295, %s3295_s27   ;;  %p2825_p0 = scmp.ge.s32.totalorder %s3295_s27, 1  ;;  %s3295_s27 = sphi %s3395_s27, %s28_s27  }
   0x5   : > { %p519_p1 = scmp.lt.s32.totalorder %s3295_s27, 3 }
   0x7   : > { %p520_p2 = pnand %p2825_p0, %p519_p1 }
   0x8   : > { %p574_p3 = scmp.lt.s32.totalorder (!%p520_p2), %s2821_s28, 1  ;;  %s3843_s0 = sld [smem:[#allocation4_spill]] (!%p520_p2) }
   0x9   : > { %523 = sbr.rel (%p520_p2) target bundleno = 5305 (0x14b9), region = 92  ;;  %s3844_s2 = sld [smem:[#allocation2_spill]] (!%p520_p2) }
   0xa   : > { %s3845_s26 = sld [smem:[#allocation3_spill]] (!%p520_p2) }
   0xe   : > { %v587_v0 = vlaneseq  ;;  %v3297_v1 = vmov 0   ;;  %v3298_v2 = vmov 0.0   ;;  %v596_v3 = vld [vmem:[%s3843_s0 + $0x8] sm:$0xff]  ;;  %s3847_s28 = smov (!%p574_p3, %s2821_s28), 1  ;;  %v595_v5 = vld [vmem:[%s3843_s0] sm:$0xff]  ;;  %vm3299_vm0 = vmmov 0  }
   0xf   : > { %3221 = vset.pattern.permute.xlu0 %v3297_v1  ;;  %3021 = vmatprep.subr.mxu1 %v3298_v2  ;;  %s2826_s20 = sshll.u32 %s3847_s28, 3  ;;  %s576_s23 = scalar_lea.vmem %s3844_s2, %s3847_s28  ;;  %v690_v9 = vld [vmem:[%s3825_s5] sm:$0xff]  ;;  %v693_v12 = vld [vmem:[%s3825_s5 + $0x18] sm:$0xff]  ;;  %v695_v13 = vld [vmem:[%s3825_s5 + $0x28] sm:$0xff]  ;;  %vm597_vm2 = vcmask 130048   ;;  %vm792_vm4 = vcmask 261120  }
  0x10   : > { %3022 = vmatpush3.msra.mxu1 %v596_v3  ;;  %v1159_v4 = vshrl.u32 %v587_v0, 7  ;;  %3222 = vset.pattern.permute.xlu1 %v3297_v1  ;;  %s580_s29 = scalar_lea.vmem %s3845_s26, %s2826_s20  ;;  %v674_v7 = vld [vmem:[%s576_s23] sm:$0x1]  ;;  %v697_v14 = vld [vmem:[%s3825_s5 + $0x38] sm:$0xff]  ;;  %v588_v15 = vand.u32 127, %v587_v0  ;;  %v691_v19 = vld [vmem:[%s3825_s5 + $0x8] sm:$0xff]  ;;  %s584_s1 = scalar_lea.vmem %s3838_s18, %s2826_s20 }
  0x11   : > { %3023 = vmatprep.subr.mxu1 %v3298_v2  ;;  %3042 = vmatprep.subr.bf16.mxu0 %v3298_v2  ;;  %v586_v8 = vld [vmem:[%s580_s29] sm:$0xff]  ;;  %vm675_vm1 = vcmp.eq.s32.totalorder %v674_v7, 0  ;;  %v692_v20 = vld [vmem:[%s3825_s5 + $0x10] sm:$0xff]  ;;  %v3224_v30 = vld [vmem:[%s3824_s4 + $0x8] sm:$0xff]   ;;  %vm923_vm5 = vcmask 1043456   ;;  %vm919_vm6 = vcmask 64512  }
  0x12   : > { %v1160_v6 = vsub.s32 0, %v1159_v4  ;;  %3024 = vmatpush3.msra.mxu1 %v595_v5  ;;  %3025 = vmatprep.mubr.msk.f32.mxu1 %vm3299_vm0, %v3298_v2  ;;  %v676_v10 = vsel %vm675_vm1, -1e+09, %v3298_v2  ;;  %v3223_v18 = vld [vmem:[%s3824_s4] sm:$0xff]   ;;  %v696_v22 = vld [vmem:[%s3825_s5 + $0x30] sm:$0xff]  ;;  %v3226_v32 = vld [vmem:[%s3824_s4 + $0x18] sm:$0xff]  }
  0x13   : > { %3044 = vmatprep.mubr.msk.bf16.mxu0 %vm3299_vm0, %v3298_v2  ;;  %590 = vperm.xlu0 %3221, %v586_v8   ;;  %v694_v21 = vld [vmem:[%s3825_s5 + $0x20] sm:$0xff]  ;;  %v3225_v31 = vld [vmem:[%s3824_s4 + $0x10] sm:$0xff]   ;;  %v3228_v38 = vld [vmem:[%s3824_s4 + $0x28] sm:$0xff]  }
  0x14   : > { %v3432_v11 = vrot.slane %v676_v10, %v1160_v6  ;;  %709 = vperm.xlu1 %3222, %v691_v19   ;;  %v672_v24 = vld [vmem:[%s3823_s3] sm:$0xff] }
  0x15   : > { %v3227_v37 = vld [vmem:[%s3824_s4 + $0x20] sm:$0xff]  }
  0x17   : > { %704 = vperm.xlu0 %3221, %v690_v9  }
  0x18   : > { %714 = vperm.xlu1 %3222, %v692_v20  }
  0x1b   : > { %719 = vperm.xlu0 %3221, %v693_v12  }
  0x1c   : > { %724 = vperm.xlu1 %3222, %v694_v21  }
  0x1f   : > { %729 = vperm.xlu0 %3221, %v695_v13  }
  0x20   : > { %734 = vperm.xlu1 %3222, %v696_v22  }
  0x23   : > { %739 = vperm.xlu0 %3221, %v697_v14  }
  0x8e   : > { %v591_v16 = vpop.permute.xlu0 %590 }
  0x8f   : > { %vm592_vm3 = vcmp.eq.s32.totalorder %v591_v16, %v588_v15  ;;  %v710_v34 = vpop.permute.xlu1 %709 }
  0x90   : > { %v2828_v17 = vsel %vm592_vm3, 1.0, %v3298_v2 }
  0x91   : > { %3026 = vmatmul.mubr.msk.f32.vlgmr.msra.gmra.mxu1 %vm597_vm2, %v2828_v17 }
  0x92   : > { %3030 = vmatprep.mubr.msk.bf16.mxu1 %vm792_vm4, %v3223_v18  ;;  %v705_v33 = vpop.permute.xlu0 %704 }
  0x93   : > { %v715_v44 = vpop.permute.xlu1 %714 }
  0x96   : > { %v720_v40 = vpop.permute.xlu0 %719 }
  0x97   : > { %v725_v52 = vpop.permute.xlu1 %724 }
  0x9a   : > { %v730_v59 = vpop.permute.xlu0 %729 }
  0x9b   : > { %v735_v61 = vpop.permute.xlu1 %734 }
  0x9e   : > { %v740_v3 = vpop.permute.xlu0 %739 }
 0x151   : > { %v667_v23 = vpop.f32.mrf.mxu1 }
 0x152   : > { %v671_v25 = vmul.f32 5.656854, %v667_v23 }
 0x153   : > { %v3027_v26 = vpop.f32.mrf.mxu1 }
 0x154   : > { %v3463_v27 = vadd.f32 %v672_v24, %v671_v25 }
 0x156   : > { %v689_v28 = vpack.c.bf16 %v3463_v27, %v3463_v27 }
 0x158   : > { %3208 = vmatprep.subr.msk.bf16.mxu1 %vm792_vm4, %v689_v28  ;;  %v812_v29 = vsel %vm792_vm4, %v689_v28, 0 }
 0x159   : > { %3029 = vmatpush3.bf16.xpose.msra.mxu1 %v812_v29 }
 0x15a   : > { %3066 = vmatprep.subr.bf16.mxu1 %v3298_v2 }
 0x160   : > { %3031 = vmatmul.mubr.msk.bf16.vlgmr.msra.gmra.mxu1 %vm792_vm4, %v3224_v30 }
 0x161   : > { %3034 = vmatprep.mubr.msk.bf16.mxu1 %vm792_vm4, %v3225_v31 }
 0x168   : > { %3035 = vmatmul.mubr.msk.bf16.gmra.mxu1 %vm792_vm4, %v3226_v32 }
 0x169   : > { %3038 = vmatprep.mubr.msk.bf16.mxu1 %vm792_vm4, %v3227_v37 }
 0x170   : > { %3039 = vmatmul.mubr.msk.bf16.gmra.mxu1 %vm792_vm4, %v3228_v38 }
 0x171   : > { %3068 = vmatprep.mubr.msk.bf16.mxu1 %vm3299_vm0, %v3298_v2 }
 0x220   : > { %v3032_v35 = vpop.f32.mrf.mxu1 }
 0x221   : > { %v857_v48 = vadd.f32 %v3032_v35, %v715_v44 }
 0x222   : > { %v848_v36 = vpop.f32.mrf.mxu1 }
 0x223   : > { %v849_v39 = vadd.f32 %v848_v36, %v705_v33  ;;  %v897_v54 = vpack.c.bf16 %v857_v48, %v857_v48 }
 0x224   : > { %v3033_v41 = vpop.f32.mrf.mxu1 }
 0x225   : > { %v895_v42 = vpack.c.bf16 %v849_v39, %v849_v39  ;;  %v860_v43 = vadd.f32 %v3033_v41, %v720_v40 }
 0x226   : > { %v851_v45 = vpop.f32.mrf.mxu1 }
 0x227   : > { %v852_v46 = vadd.f32 %v851_v45, %v710_v34  ;;  %903 = vxpose.xlu1.c.b16.start.end [1/1] (short) (narrow) %v895_v42, 16  ;;  %v898_v49 = vpack.c.bf16 %v860_v43, %v860_v43  ;;  %v699_v42 = vld [vmem:[%s3825_s5 + $0x48] sm:$0xff] }
 0x228   : > { %v3036_v47 = vpop.f32.mrf.mxu1 }
 0x229   : > { %v896_v50 = vpack.c.bf16 %v852_v46, %v852_v46  ;;  %v873_v1 = vadd.f32 %v3036_v47, %v735_v61 }
 0x22a   : > { %v864_v51 = vpop.f32.mrf.mxu1 }
 0x22b   : > { %967 = vxpose.xlu0.c.b16.start.end [1/1] (short) (narrow) %v896_v50, 16  ;;  %1091 = vxpose.xlu1.c.b16.start.end [1/1] (short) (narrow) %v898_v49, 16  ;;  %v865_v53 = vadd.f32 %v864_v51, %v725_v52  ;;  %v901_v4 = vpack.c.bf16 %v873_v1, %v873_v1  ;;  %v701_v1 = vld [vmem:[%s3825_s5 + $0x58] sm:$0xff] }
 0x22c   : > { %v3037_v57 = vpop.f32.mrf.mxu1 }
 0x22d   : > { %v899_v55 = vpack.c.bf16 %v865_v53, %v865_v53  ;;  %v876_v6 = vadd.f32 %v3037_v57, %v740_v3  ;;  %v1049_v7 = vsel %vm923_vm5, %v901_v4, 0 }
 0x22e   : > { %v867_v58 = vpop.f32.mrf.mxu1 }
 0x22f   : > { %1029 = vxpose.xlu0.c.b16.start.end [1/1] (short) (narrow) %v897_v54, 16  ;;  %v925_v56 = vsel %vm923_vm5, %v899_v55, 0  ;;  %v868_v60 = vadd.f32 %v867_v58, %v730_v59  ;;  %v902_v8 = vpack.c.bf16 %v876_v6, %v876_v6 }
 0x230   : > { %3043 = vmatpush3.bf16.msra.mxu0 %v925_v56  ;;  %v698_v56 = vld [vmem:[%s3825_s5 + $0x40] sm:$0xff] }
 0x231   : > { %3048 = vmatprep.subr.bf16.mxu0 %v3298_v2  ;;  %v900_v62 = vpack.c.bf16 %v868_v60, %v868_v60  ;;  %v1111_v10 = vsel %vm923_vm5, %v902_v8, 0 }
 0x233   : > { %v987_v0 = vsel %vm923_vm5, %v900_v62, 0  ;;  %v700_v62 = vld [vmem:[%s3825_s5 + $0x50] sm:$0xff] }
 0x289   : > { %v911_v63 = vpop.trf.xlu1 }
 0x28a   : > { %3045 = vmatmul.mubr.msk.bf16.vlgmr.msra.gmra.mxu0 %vm919_vm6, %v911_v63 }
 0x28b   : > { %3049 = vmatpush3.bf16.msra.mxu0 %v987_v0  ;;  %3050 = vmatprep.mubr.msk.bf16.mxu0 %vm3299_vm0, %v3298_v2 }
 0x28c   : > { %3054 = vmatprep.subr.bf16.mxu0 %v3298_v2 }
 0x28d   : > { %v975_v5 = vpop.trf.xlu0  ;;  %v1099_v12 = vpop.trf.xlu1 }
 0x291   : > { %v1037_v9 = vpop.trf.xlu0 }
 0x292   : > { %3051 = vmatmul.mubr.msk.bf16.vlgmr.msra.gmra.mxu0 %vm919_vm6, %v975_v5 }
 0x293   : > { %3055 = vmatpush3.bf16.msra.mxu0 %v1049_v7  ;;  %3056 = vmatprep.mubr.msk.bf16.mxu0 %vm3299_vm0, %v3298_v2  ;;  %v3040_v7 = vpop.f32.mrf.mxu1 }
 0x294   : > { %3060 = vmatprep.subr.bf16.mxu0 %v3298_v2 }
 0x29a   : > { %3057 = vmatmul.mubr.msk.bf16.vlgmr.msra.gmra.mxu0 %vm919_vm6, %v1037_v9 }
 0x29b   : > { %3061 = vmatpush3.bf16.msra.mxu0 %v1111_v10  ;;  %3062 = vmatprep.mubr.msk.bf16.mxu0 %vm3299_vm0, %v3298_v2  ;;  %v880_v10 = vpop.f32.mrf.mxu1 }
 0x29c   : > { %3072 = vmatprep.subr.bf16.mxu0 %v3298_v2 }
 0x2a2   : > { %3063 = vmatmul.mubr.msk.bf16.vlgmr.msra.gmra.mxu0 %vm919_vm6, %v1099_v12 }
 0x2a3   : > { %3074 = vmatprep.mubr.msk.bf16.mxu0 %vm3299_vm0, %v3298_v2 }
 0x34a   : > { %v961_v13 = vpop.f32.mrf.mxu0 }
 0x34b   : > { %v1153_v14 = vmul.f32 0.35355338, %v961_v13 }
 0x34c   : > { %v3046_v15 = vpop.f32.mrf.mxu0 }
 0x34d   : > { %v1163_v16 = vadd.f32 %v3432_v11, %v1153_v14 }
 0x34e   : > { %v964_v17 = vpop.f32.mrf.mxu0 }
 0x34f   : > { %v1167_v18 = vsel %vm919_vm6, %v1163_v16, -inf }
 0x350   : > { %v3047_v19 = vpop.f32.mrf.mxu0  ;;  %1168 = vmax.xlane.f32.xlu0 %v1167_v18 }
 0x352   : > { %v1023_v20 = vpop.f32.mrf.mxu0 }
 0x353   : > { %v1154_v21 = vmul.f32 0.35355338, %v1023_v20 }
 0x354   : > { %v3052_v22 = vpop.f32.mrf.mxu0 }
 0x355   : > { %v1164_v23 = vadd.f32 %v3432_v11, %v1154_v21 }
 0x356   : > { %v1026_v24 = vpop.f32.mrf.mxu0 }
 0x357   : > { %v1170_v25 = vsel %vm919_vm6, %v1164_v23, -inf }
 0x358   : > { %v3053_v26 = vpop.f32.mrf.mxu0  ;;  %1171 = vmax.xlane.f32.xlu1 %v1170_v25 }
 0x35a   : > { %v1085_v28 = vpop.f32.mrf.mxu0 }
 0x35b   : > { %v1155_v29 = vmul.f32 0.35355338, %v1085_v28 }
 0x35c   : > { %v3058_v30 = vpop.f32.mrf.mxu0 }
 0x35d   : > { %v1165_v31 = vadd.f32 %v3432_v11, %v1155_v29 }
 0x35e   : > { %v1088_v32 = vpop.f32.mrf.mxu0 }
 0x35f   : > { %v1173_v33 = vsel %vm919_vm6, %v1165_v31, -inf }
 0x360   : > { %v3059_v34 = vpop.f32.mrf.mxu0  ;;  %1174 = vmax.xlane.f32.xlu0 %v1173_v33 }
 0x362   : > { %v1147_v35 = vpop.f32.mrf.mxu0 }
 0x363   : > { %v1156_v36 = vmul.f32 0.35355338, %v1147_v35 }
 0x364   : > { %v3064_v37 = vpop.f32.mrf.mxu0 }
 0x365   : > { %v1166_v38 = vadd.f32 %v3432_v11, %v1156_v36 }
 0x366   : > { %v1150_v39 = vpop.f32.mrf.mxu0 }
 0x367   : > { %v1176_v40 = vsel %vm919_vm6, %v1166_v38, -inf }
 0x368   : > { %1177 = vmax.xlane.f32.xlu1 %v1176_v40  ;;  %v3065_v41 = vpop.f32.mrf.mxu0 }
 0x369   : > { %v3229_v41 = vld [vmem:[%s3826_s6 + $0x8] sm:$0xff]  }
 0x379   : > { %749 = vperm.xlu1 %3222, %v699_v42   ;;  %v3230_v42 = vld [vmem:[%s3826_s6] sm:$0xff]  }
 0x3d9   : > { %v1169_v43 = vpop.xlane.xlu0 %1168 }
 0x3da   : > { %v1179_v44 = vsub.f32 %v1163_v16, %v1169_v43  ;;  %v3041_v16 = vpop.f32.mrf.mxu1 }
 0x3dc   : > { %v1183_v45 = vmul.f32 1.442695, %v1179_v44  ;;  %v883_v21 = vpop.f32.mrf.mxu1 }
 0x3de   : > { %3249 = vpow2.f32 %v1183_v45 }
 0x3e1   : > { %v1172_v46 = vpop.xlane.xlu1 %1171 }
 0x3e2   : > { %v1180_v47 = vsub.f32 %v1164_v23, %v1172_v46 }
 0x3e4   : > { %v1185_v48 = vmul.f32 1.442695, %v1180_v47 }
 0x3e6   : > { %3251 = vpow2.f32 %v1185_v48 }
 0x3e9   : > { %v1175_v59 = vpop.xlane.xlu0 %1174 }
 0x3ea   : > { %v1181_v60 = vsub.f32 %v1165_v31, %v1175_v59 }
 0x3eb   : > { %v3250_v49 = vpop.eup %3249 }
 0x3ec   : > { %v1191_v50 = vsel %vm919_vm6, %v3250_v49, 0.0  ;;  %v1187_v61 = vmul.f32 1.442695, %v1181_v60 }
 0x3ed   : > { %1192 = vadd.xlane.f32.xlu0 %v1191_v50 }
 0x3f1   : > { %v1178_v51 = vpop.xlane.xlu1 %1177 }
 0x3f2   : > { %v1182_v52 = vsub.f32 %v1166_v38, %v1178_v51 }
 0x3f3   : > { %v3252_v53 = vpop.eup %3251 }
 0x3f4   : > { %v1189_v54 = vmul.f32 1.442695, %v1182_v52  ;;  %v1194_v55 = vsel %vm919_vm6, %v3252_v53, 0.0 }
 0x3f5   : > { %1195 = vadd.xlane.f32.xlu1 %v1194_v55  ;;  %v750_v4 = vpop.permute.xlu1 %749 }
 0x3f6   : > { %3253 = vpow2.f32 %v1189_v54  ;;  %v884_v23 = vadd.f32 %v883_v21, %v750_v4 }
 0x3f7   : > { %3255 = vpow2.f32 %v1187_v61 }
 0x3f8   : > { %v1212_v24 = vpack.c.bf16 %v884_v23, %v884_v23 }
 0x403   : > { %v3254_v57 = vpop.eup %3253  ;;  %744 = vperm.xlu0 %3221, %v698_v56  }
 0x404   : > { %v1200_v58 = vsel %vm919_vm6, %v3254_v57, 0.0  ;;  %v3256_v63 = vpop.eup %3255 }
 0x405   : > { %1201 = vadd.xlane.f32.xlu1 %v1200_v58  ;;  %v1197_v0 = vsel %vm919_vm6, %v3256_v63, 0.0 }
 0x416   : > { %754 = vperm.xlu1 %3222, %v700_v62   ;;  %v2850_v62 = vld [vmem:[%s3827_s7] ss:$0 sm:$0xff] }
 0x422   : > { %1198 = vadd.xlane.f32.xlu0 %v1197_v0 }
 0x438   : > { %759 = vperm.xlu0 %3221, %v701_v1  }
 0x476   : > { %v1193_v3 = vpop.xlane.xlu0 %1192 }
 0x477   : > { %3257 = vrcp.f32 %v1193_v3 }
 0x47e   : > { %v1196_v5 = vpop.xlane.xlu1 %1195  ;;  %v745_v12 = vpop.permute.xlu0 %744 }
 0x47f   : > { %3259 = vrcp.f32 %v1196_v5  ;;  %v881_v14 = vadd.f32 %v880_v10, %v745_v12 }
 0x481   : > { %v1211_v19 = vpack.c.bf16 %v881_v14, %v881_v14 }
 0x484   : > { %v3258_v6 = vpop.eup %3257 }
 0x485   : > { %v1207_v8 = vmul.f32 %v3258_v6, %v3250_v49 }
 0x487   : > { %v1215_v9 = vpack.c.bf16 %v1207_v8, %v1207_v8 }
 0x489   : > { %v1223_v13 = vsel %vm919_vm6, %v1215_v9, 0 }
 0x48a   : > { %3067 = vmatpush3.bf16.xpose.msra.mxu1 %v1223_v13  ;;  %v3231_v13 = vld [vmem:[%s3830_s10 + $0x8] sm:$0xff]  }
 0x48b   : > { %3078 = vmatprep.subr.bf16.mxu1 %v3298_v2 }
 0x48c   : > { %v3260_v15 = vpop.eup %3259 }
 0x48d   : > { %v1208_v17 = vmul.f32 %v3260_v15, %v3252_v53 }
 0x48e   : > { %v1202_v18 = vpop.xlane.xlu1 %1201 }
 0x48f   : > { %3261 = vrcp.f32 %v1202_v18  ;;  %v1216_v20 = vpack.c.bf16 %v1208_v17, %v1208_v17  ;;  %v2854_v18 = vld [vmem:[%s3828_s8] ss:$0 sm:$0xff] }
 0x491   : > { %3069 = vmatmul.mubr.msk.bf16.vlgmr.msra.gmra.mxu1 %vm919_vm6, %v1211_v19  ;;  %v1269_v22 = vsel %vm919_vm6, %v1216_v20, 0  ;;  %v2855_v20 = vld [vmem:[%s3829_s9] ss:$0 sm:$0xff] }
 0x492   : > { %3073 = vmatpush3.bf16.xpose.msra.mxu0 %v1269_v22  ;;  %3080 = vmatprep.mubr.msk.bf16.mxu1 %vm3299_vm0, %v3298_v2  ;;  %v755_v37 = vpop.permute.xlu1 %754 }
 0x493   : > { %3084 = vmatprep.subr.bf16.mxu0 %v3298_v2  ;;  %v889_v39 = vadd.f32 %v3040_v7, %v755_v37 }
 0x495   : > { %v1213_v40 = vpack.c.bf16 %v889_v39, %v889_v39 }
 0x499   : > { %3075 = vmatmul.mubr.msk.bf16.vlgmr.msra.gmra.mxu0 %vm919_vm6, %v1212_v24  ;;  %v3233_v24 = vld [vmem:[%s3832_s12 + $0x8] sm:$0xff]  }
 0x49a   : > { %3086 = vmatprep.mubr.msk.bf16.mxu0 %vm3299_vm0, %v3298_v2 }
 0x49c   : > { %v3262_v25 = vpop.eup %3261 }
 0x49d   : > { %v1210_v26 = vmul.f32 %v3262_v25, %v3254_v57  ;;  %v3234_v25 = vld [vmem:[%s3832_s12] sm:$0xff]  }
 0x49f   : > { %v1218_v28 = vpack.c.bf16 %v1210_v26, %v1210_v26  ;;  %v2856_v26 = vld [vmem:[%s3831_s11] ss:$0 sm:$0xff] }
 0x4a1   : > { %v1361_v29 = vsel %vm919_vm6, %v1218_v28, 0 }
 0x4a2   : > { %3085 = vmatpush3.bf16.xpose.msra.mxu0 %v1361_v29 }
 0x4a3   : > { %3098 = vmatprep.subr.bf16.mxu0 %v3298_v2 }
 0x4ab   : > { %v1199_v30 = vpop.xlane.xlu0 %1198 }
 0x4ac   : > { %3263 = vrcp.f32 %v1199_v30 }
 0x4b3   : > { %v760_v31 = vpop.permute.xlu0 %759 }
 0x4b4   : > { %v892_v32 = vadd.f32 %v3041_v16, %v760_v31 }
 0x4b6   : > { %v1214_v33 = vpack.c.bf16 %v892_v32, %v892_v32 }
 0x4b8   : > { %3087 = vmatmul.mubr.msk.bf16.vlgmr.msra.gmra.mxu0 %vm919_vm6, %v1214_v33 }
 0x4b9   : > { %v3264_v34 = vpop.eup %3263  ;;  %3102 = vmatprep.mubr.msk.bf16.mxu0 %vm3299_vm0, %v3298_v2  ;;  %3099 = vmatpush3.bf16.msra.mxu0 %v3231_v13 }
 0x4ba   : > { %v1209_v35 = vmul.f32 %v3264_v34, %v3256_v63  ;;  %3100 = vmatprep.subr.bf16.mxu0 %v3298_v2 }
 0x4bc   : > { %v1217_v36 = vpack.c.bf16 %v1209_v35, %v1209_v35  ;;  %v2860_v35 = vld [vmem:[%s3833_s13] ss:$0 sm:$0xff] }
 0x4be   : > { %v1315_v38 = vsel %vm919_vm6, %v1217_v36, 0 }
 0x4bf   : > { %3079 = vmatpush3.bf16.xpose.msra.mxu1 %v1315_v38 }
 0x4c0   : > { %3090 = vmatprep.subr.bf16.mxu1 %v3298_v2 }
 0x4c6   : > { %3081 = vmatmul.mubr.msk.bf16.vlgmr.msra.gmra.mxu1 %vm919_vm6, %v1213_v40 }
 0x4c7   : > { %3094 = vmatprep.mubr.msk.bf16.mxu1 %vm3299_vm0, %v3298_v2  ;;  %3091 = vmatpush3.bf16.msra.mxu1 %v3229_v41 }
 0x4c8   : > { %3092 = vmatprep.subr.bf16.mxu1 %v3298_v2 }
 0x4cb   : > { %3093 = vmatpush3.bf16.msra.mxu1 %v3230_v42 }
 0x4cc   : > { %3106 = vmatprep.subr.bf16.mxu1 %v3298_v2 }
 0x551   : > { %v1259_v43 = vpop.f32.mrf.mxu1 }
 0x553   : > { %v3070_v44 = vpop.f32.mrf.mxu1 }
 0x554   : > { %v2880_v44 = vld [vmem:[%s3825_s5 + $0x70] sm:$0xff] }
 0x555   : > { %v1262_v45 = vpop.f32.mrf.mxu1 }
 0x556   : > { %v2881_v45 = vld [vmem:[%s3825_s5 + $0x78] sm:$0xff] }
 0x557   : > { %v3071_v46 = vpop.f32.mrf.mxu1 }
 0x558   : > { %v2883_v46 = vld [vmem:[%s3825_s5 + $0x88] sm:$0xff] }
 0x559   : > { %v1305_v47 = vpop.f32.mrf.mxu0 }
 0x55a   : > { %v1403_v48 = vpack.c.bf16 %v1305_v47, %v1259_v43  ;;  %v2878_v43 = vld [vmem:[%s3825_s5 + $0x60] sm:$0xff]  ;;  %v2885_v47 = vld [vmem:[%s3825_s5 + $0x98] sm:$0xff] }
 0x55b   : > { %v3076_v49 = vpop.f32.mrf.mxu0 }
 0x55c   : > { %1416 = vxpose.xlu1.c.b16.start [1/2] (short) (narrow) %v1403_v48, 16 }
 0x55d   : > { %v1308_v50 = vpop.f32.mrf.mxu0 }
 0x55f   : > { %v3077_v51 = vpop.f32.mrf.mxu0 }
 0x578   : > { %v1397_v52 = vpop.f32.mrf.mxu0 }
 0x57a   : > { %v3088_v53 = vpop.f32.mrf.mxu0 }
 0x57b   : > { %v2879_v53 = vld [vmem:[%s3825_s5 + $0x68] sm:$0xff] }
 0x57c   : > { %v1400_v54 = vpop.f32.mrf.mxu0 }
 0x57d   : > { %v2882_v54 = vld [vmem:[%s3825_s5 + $0x80] sm:$0xff] }
 0x57e   : > { %v3089_v55 = vpop.f32.mrf.mxu0 }
 0x57f   : > { %v2884_v55 = vld [vmem:[%s3825_s5 + $0x90] sm:$0xff] }
 0x586   : > { %v1351_v56 = vpop.f32.mrf.mxu1 }
 0x587   : > { %v1404_v57 = vpack.c.bf16 %v1397_v52, %v1351_v56  ;;  %v3235_v56 = vld [vmem:[%s3824_s4 + $0x30] sm:$0xff]  }
 0x588   : > { %v3082_v58 = vpop.f32.mrf.mxu1 }
 0x589   : > { %1417 = vxpose.xlu1.c.b16.end [2/2] (short) (narrow) %v1404_v57, 16 }
 0x58a   : > { %v1354_v59 = vpop.f32.mrf.mxu1 }
 0x58c   : > { %v3083_v60 = vpop.f32.mrf.mxu1 }
 0x5e7   : > { %v1424_v61 = vpop.trf.xlu1 }
 0x5e8   : > { %3095 = vmatmul.mubr.msk.bf16.vlgmr.msra.gmra.mxu1 %vm792_vm4, %v1424_v61  ;;  %v2864_v61 = vld [vmem:[%s3834_s14] ss:$0 sm:$0xff] }
 0x5e9   : > { %3110 = vmatprep.mubr.msk.bf16.mxu1 %vm3299_vm0, %v3298_v2  ;;  %3107 = vmatpush3.bf16.msra.mxu1 %v3233_v24 }
 0x5ea   : > { %3108 = vmatprep.subr.bf16.mxu1 %v3298_v2 }
 0x5ed   : > { %3109 = vmatpush3.bf16.msra.mxu1 %v3234_v25 }
 0x5ee   : > { %3128 = vmatprep.subr.bf16.mxu1 %v3298_v2 }
 0x6a8   : > { %v1481_v63 = vpop.f32.mrf.mxu1 }
 0x6a9   : > { %v1482_v0 = vadd.f32 %v2850_v62, %v1481_v63  ;;  %v2865_v63 = vld [vmem:[%s3835_s15] ss:$0 sm:$0xff] }
 0x6aa   : > { %v3096_v1 = vpop.f32.mrf.mxu1 }
 0x6ab   : > { %v1487_v3 = vadd.f32 %v1482_v0, %v3463_v27  ;;  %v3232_v27 = vld [vmem:[%s3830_s10] sm:$0xff]  }
 0x6ac   : > { %v1484_v4 = vpop.f32.mrf.mxu1  ;;  %3101 = vmatpush3.bf16.msra.mxu0 %v3232_v27 }
 0x6ad   : > { %v1490_v5 = vsel %vm792_vm4, %v1487_v3, 0.0 }
 0x6ae   : > { %1491 = vadd.xlane.f32.xlu0 %v1490_v5  ;;  %v3097_v6 = vpop.f32.mrf.mxu1  ;;  %v3236_v5 = vld [vmem:[%s3824_s4 + $0x38] sm:$0xff]  }
 0x6af   : > { %v3237_v6 = vld [vmem:[%s3824_s4 + $0x40] sm:$0xff]  }
 0x737   : > { %v1492_v7 = vpop.xlane.xlu0 %1491 }
 0x738   : > { %v1494_v8 = vmul.f32 0.03125, %v1492_v7  ;;  %v3238_v7 = vld [vmem:[%s3824_s4 + $0x48] sm:$0xff]  }
 0x73a   : > { %v1495_v9 = vsub.f32 %v1487_v3, %v1494_v8  ;;  %v3239_v8 = vld [vmem:[%s3824_s4 + $0x50] sm:$0xff]  }
 0x73c   : > { %v1496_v10 = vmul.f32 %v1495_v9, %v1495_v9 }
 0x73e   : > { %v1497_v12 = vsel %vm792_vm4, %v1496_v10, 0.0 }
 0x73f   : > { %1498 = vadd.xlane.f32.xlu0 %v1497_v12 }
 0x7c8   : > { %v1499_v14 = vpop.xlane.xlu0 %1498 }
 0x7c9   : > { %v1500_v15 = vmul.f32 0.03125, %v1499_v14 }
 0x7cb   : > { %v1501_v16 = vadd.f32 1e-05, %v1500_v15 }
 0x7cd   : > { %3265 = vrsqrt.f32 %v1501_v16 }
 0x7da   : > { %v3266_v17 = vpop.eup %3265 }
 0x7db   : > { %v1503_v19 = vmul.f32 %v3266_v17, %v1495_v9  ;;  %v3240_v9 = vld [vmem:[%s3824_s4 + $0x58] sm:$0xff]  }
 0x7dd   : > { %v1510_v21 = vmul.f32 %v2854_v18, %v1503_v19 }
 0x7df   : > { %v1517_v22 = vadd.f32 %v2855_v20, %v1510_v21 }
 0x7e1   : > { %v1522_v23 = vpack.c.bf16 %v1517_v22, %v1517_v22 }
 0x7e3   : > { %3103 = vmatmul.mubr.msk.bf16.vlgmr.msra.gmra.mxu0 %vm792_vm4, %v1522_v23 }
 0x7e4   : > { %3116 = vmatprep.mubr.msk.bf16.mxu0 %vm792_vm4, %v3235_v56 }
 0x8a3   : > { %v1579_v28 = vpop.f32.mrf.mxu0 }
 0x8a4   : > { %v1580_v29 = vadd.f32 %v2856_v26, %v1579_v28 }
 0x8a5   : > { %v3104_v30 = vpop.f32.mrf.mxu0 }
 0x8a6   : > { %v1585_v31 = vmax.f32 %v1580_v29, 0.0 }
 0x8a7   : > { %v1582_v32 = vpop.f32.mrf.mxu0 }
 0x8a8   : > { %v1590_v33 = vpack.c.bf16 %v1585_v31, %v1585_v31 }
 0x8a9   : > { %v3105_v34 = vpop.f32.mrf.mxu0 }
 0x8aa   : > { %3111 = vmatmul.mubr.msk.bf16.vlgmr.msra.gmra.mxu1 %vm792_vm4, %v1590_v33 }
 0x8ab   : > { %3130 = vmatprep.mubr.msk.bf16.mxu1 %vm3299_vm0, %v3298_v2 }
 0x96a   : > { %v1647_v36 = vpop.f32.mrf.mxu1 }
 0x96b   : > { %v1648_v37 = vadd.f32 %v2860_v35, %v1647_v36 }
 0x96c   : > { %v3112_v38 = vpop.f32.mrf.mxu1 }
 0x96d   : > { %v1653_v39 = vadd.f32 %v1648_v37, %v1517_v22 }
 0x96e   : > { %v1650_v40 = vpop.f32.mrf.mxu1 }
 0x96f   : > { %v1656_v41 = vsel %vm792_vm4, %v1653_v39, 0.0 }
 0x970   : > { %1657 = vadd.xlane.f32.xlu0 %v1656_v41  ;;  %v3113_v42 = vpop.f32.mrf.mxu1 }
 0x986   : > { %1712 = vperm.xlu0 %3221, %v2878_v43  }
 0x98a   : > { %1722 = vperm.xlu0 %3221, %v2880_v44  }
 0x98e   : > { %1727 = vperm.xlu0 %3221, %v2881_v45  }
 0x992   : > { %1737 = vperm.xlu0 %3221, %v2883_v46  }
 0x996   : > { %1747 = vperm.xlu0 %3221, %v2885_v47  }
 0x9f9   : > { %v1658_v48 = vpop.xlane.xlu0 %1657 }
 0x9fa   : > { %v1659_v49 = vmul.f32 0.03125, %v1658_v48 }
 0x9fc   : > { %v1660_v50 = vsub.f32 %v1653_v39, %v1659_v49 }
 0x9fe   : > { %v1661_v51 = vmul.f32 %v1660_v50, %v1660_v50 }
 0xa00   : > { %v1662_v52 = vsel %vm792_vm4, %v1661_v51, 0.0 }
 0xa01   : > { %1663 = vadd.xlane.f32.xlu1 %v1662_v52  ;;  %v1713_v10 = vpop.permute.xlu0 %1712 }
 0xa05   : > { %v1723_v12 = vpop.permute.xlu0 %1722 }
 0xa09   : > { %v1728_v13 = vpop.permute.xlu0 %1727 }
 0xa0d   : > { %v1738_v20 = vpop.permute.xlu0 %1737 }
 0xa11   : > { %v1748_v31 = vpop.permute.xlu0 %1747 }
 0xa12   : > { %1717 = vperm.xlu1 %3222, %v2879_v53  }
 0xa16   : > { %1732 = vperm.xlu1 %3222, %v2882_v54  }
 0xa1a   : > { %1742 = vperm.xlu1 %3222, %v2884_v55  }
 0xa8a   : > { %v1664_v57 = vpop.xlane.xlu1 %1663 }
 0xa8b   : > { %v1665_v58 = vmul.f32 0.03125, %v1664_v57 }
 0xa8d   : > { %v1666_v59 = vadd.f32 1e-05, %v1665_v58 }
 0xa8e   : > { %v1718_v16 = vpop.permute.xlu1 %1717 }
 0xa8f   : > { %3267 = vrsqrt.f32 %v1666_v59 }
 0xa92   : > { %v1733_v28 = vpop.permute.xlu1 %1732 }
 0xa96   : > { %v1743_v41 = vpop.permute.xlu1 %1742 }
 0xa9c   : > { %v3268_v60 = vpop.eup %3267 }
 0xa9d   : > { %v1668_v62 = vmul.f32 %v3268_v60, %v1660_v50 }
 0xa9f   : > { %v1675_v0 = vmul.f32 %v2864_v61, %v1668_v62 }
 0xaa1   : > { %v3640_v1 = vadd.f32 %v2865_v63, %v1675_v0 }
 0xaa3   : > { %v1696_v3 = vpack.c.bf16 %v3640_v1, %v3640_v1 }
 0xaa5   : > { %3209 = vmatprep.subr.msk.bf16.mxu0 %vm792_vm4, %v1696_v3  ;;  %v1819_v4 = vsel %vm792_vm4, %v1696_v3, 0 }
 0xaa6   : > { %3115 = vmatpush3.bf16.xpose.msra.mxu0 %v1819_v4 }
 0xaa7   : > { %3146 = vmatprep.subr.bf16.mxu0 %v3298_v2 }
 0xaad   : > { %3117 = vmatmul.mubr.msk.bf16.vlgmr.msra.gmra.mxu0 %vm792_vm4, %v3236_v5 }
 0xaae   : > { %3120 = vmatprep.mubr.msk.bf16.mxu0 %vm792_vm4, %v3237_v6 }
 0xab5   : > { %3121 = vmatmul.mubr.msk.bf16.gmra.mxu0 %vm792_vm4, %v3238_v7 }
 0xab6   : > { %3124 = vmatprep.mubr.msk.bf16.mxu0 %vm792_vm4, %v3239_v8 }
 0xabd   : > { %3125 = vmatmul.mubr.msk.bf16.gmra.mxu0 %vm792_vm4, %v3240_v9 }
 0xabe   : > { %3148 = vmatprep.mubr.msk.bf16.mxu0 %vm3299_vm0, %v3298_v2 }
 0xb6d   : > { %v3118_v27 = vpop.f32.mrf.mxu0 }
 0xb6e   : > { %v1864_v24 = vadd.f32 %v3118_v27, %v1723_v12 }
 0xb6f   : > { %v1855_v14 = vpop.f32.mrf.mxu0 }
 0xb70   : > { %v1856_v15 = vadd.f32 %v1855_v14, %v1713_v10  ;;  %v1904_v33 = vpack.c.bf16 %v1864_v24, %v1864_v24 }
 0xb71   : > { %v3119_v17 = vpop.f32.mrf.mxu0 }
 0xb72   : > { %v1902_v18 = vpack.c.bf16 %v1856_v15, %v1856_v15  ;;  %v1867_v19 = vadd.f32 %v3119_v17, %v1728_v13 }
 0xb73   : > { %v1858_v21 = vpop.f32.mrf.mxu0 }
 0xb74   : > { %v1859_v22 = vadd.f32 %v1858_v21, %v1718_v16  ;;  %1910 = vxpose.xlu1.c.b16.start.end [1/1] (short) (narrow) %v1902_v18, 16  ;;  %v1905_v25 = vpack.c.bf16 %v1867_v19, %v1867_v19 }
 0xb75   : > { %v3122_v23 = vpop.f32.mrf.mxu0 }
 0xb76   : > { %v1903_v26 = vpack.c.bf16 %v1859_v22, %v1859_v22  ;;  %v1880_v44 = vadd.f32 %v3122_v23, %v1743_v41  ;;  %v2888_v41 = vld [vmem:[%s3825_s5 + $0xb0] sm:$0xff] }
 0xb77   : > { %v1871_v29 = vpop.f32.mrf.mxu0 }
 0xb78   : > { %v1872_v30 = vadd.f32 %v1871_v29, %v1733_v28  ;;  %1972 = vxpose.xlu0.c.b16.start.end [1/1] (short) (narrow) %v1903_v26, 16  ;;  %2096 = vxpose.xlu1.c.b16.start.end [1/1] (short) (narrow) %v1905_v25, 16  ;;  %v1908_v47 = vpack.c.bf16 %v1880_v44, %v1880_v44  ;;  %v2889_v44 = vld [vmem:[%s3825_s5 + $0xb8] sm:$0xff] }
 0xb79   : > { %v3123_v32 = vpop.f32.mrf.mxu0 }
 0xb7a   : > { %v1906_v34 = vpack.c.bf16 %v1872_v30, %v1872_v30  ;;  %v1883_v35 = vadd.f32 %v3123_v32, %v1748_v31  ;;  %v2054_v49 = vsel %vm923_vm5, %v1908_v47, 0 }
 0xb7b   : > { %v1874_v39 = vpop.f32.mrf.mxu0 }
 0xb7c   : > { %v1930_v36 = vsel %vm923_vm5, %v1906_v34, 0  ;;  %v1909_v37 = vpack.c.bf16 %v1883_v35, %v1883_v35  ;;  %2034 = vxpose.xlu0.c.b16.start.end [1/1] (short) (narrow) %v1904_v33, 16  ;;  %v1875_v40 = vadd.f32 %v1874_v39, %v1738_v20  ;;  %v2887_v39 = vld [vmem:[%s3825_s5 + $0xa8] sm:$0xff] }
 0xb7d   : > { %3129 = vmatpush3.bf16.msra.mxu1 %v1930_v36  ;;  %v3689_v51 = vpop.f32.mrf.mxu0  ;;  %v2886_v36 = vld [vmem:[%s3825_s5 + $0xa0] sm:$0xff] }
 0xb7e   : > { %v2116_v38 = vsel %vm923_vm5, %v1909_v37, 0  ;;  %3134 = vmatprep.subr.bf16.mxu1 %v3298_v2  ;;  %v1907_v42 = vpack.c.bf16 %v1875_v40, %v1875_v40 }
 0xb7f   : > { %3147 = vmatpush3.bf16.msra.mxu0 %v2116_v38  ;;  %v3691_v52 = vpop.f32.mrf.mxu0 }
 0xb80   : > { %3158 = vmatprep.subr.bf16.mxu0 %v3298_v2  ;;  %v1992_v45 = vsel %vm923_vm5, %v1907_v42, 0 }
 0xb81   : > { %v3693_v53 = vpop.f32.mrf.mxu0 }
 0xb83   : > { %v3695_v55 = vpop.f32.mrf.mxu0 }
 0xbd6   : > { %v1918_v43 = vpop.trf.xlu1 }
 0xbd7   : > { %3131 = vmatmul.mubr.msk.bf16.vlgmr.msra.gmra.mxu1 %vm919_vm6, %v1918_v43 }
 0xbd8   : > { %3135 = vmatpush3.bf16.msra.mxu1 %v1992_v45  ;;  %3136 = vmatprep.mubr.msk.bf16.mxu1 %vm3299_vm0, %v3298_v2 }
 0xbd9   : > { %3140 = vmatprep.subr.bf16.mxu1 %v3298_v2 }
 0xbda   : > { %v2104_v46 = vpop.trf.xlu1  ;;  %v1980_v48 = vpop.trf.xlu0 }
 0xbdb   : > { %3149 = vmatmul.mubr.msk.bf16.vlgmr.msra.gmra.mxu0 %vm919_vm6, %v2104_v46 }
 0xbdc   : > { %3160 = vmatprep.mubr.msk.bf16.mxu0 %vm3299_vm0, %v3298_v2 }
 0xbde   : > { %v2042_v50 = vpop.trf.xlu0 }
 0xbdf   : > { %3137 = vmatmul.mubr.msk.bf16.vlgmr.msra.gmra.mxu1 %vm919_vm6, %v1980_v48 }
 0xbe0   : > { %3141 = vmatpush3.bf16.msra.mxu1 %v2054_v49  ;;  %3142 = vmatprep.mubr.msk.bf16.mxu1 %vm3299_vm0, %v3298_v2 }
 0xbe1   : > { %3152 = vmatprep.subr.bf16.mxu1 %v3298_v2 }
 0xbe7   : > { %3143 = vmatmul.mubr.msk.bf16.vlgmr.msra.gmra.mxu1 %vm919_vm6, %v2042_v50 }
 0xbe8   : > { %3154 = vmatprep.mubr.msk.bf16.mxu1 %vm3299_vm0, %v3298_v2 }
 0xc97   : > { %v1966_v54 = vpop.f32.mrf.mxu1 }
 0xc98   : > { %v2158_v56 = vmul.f32 0.35355338, %v1966_v54 }
 0xc99   : > { %v3132_v57 = vpop.f32.mrf.mxu1 }
 0xc9a   : > { %v2162_v58 = vadd.f32 %v2158_v56, %v3432_v11 }
 0xc9b   : > { %v1969_v59 = vpop.f32.mrf.mxu1  ;;  %v2152_v60 = vpop.f32.mrf.mxu0 }
 0xc9c   : > { %v2166_v61 = vsel %vm919_vm6, %v2162_v58, -inf  ;;  %v2161_v0 = vmul.f32 0.35355338, %v2152_v60 }
 0xc9d   : > { %2167 = vmax.xlane.f32.xlu0 %v2166_v61  ;;  %v3133_v62 = vpop.f32.mrf.mxu1  ;;  %v3150_v63 = vpop.f32.mrf.mxu0 }
 0xc9e   : > { %v2165_v9 = vadd.f32 %v2161_v0, %v3432_v11 }
 0xc9f   : > { %v2028_v3 = vpop.f32.mrf.mxu1  ;;  %v2155_v4 = vpop.f32.mrf.mxu0 }
 0xca0   : > { %v2159_v5 = vmul.f32 0.35355338, %v2028_v3  ;;  %v2175_v27 = vsel %vm919_vm6, %v2165_v9, -inf }
 0xca1   : > { %v3138_v6 = vpop.f32.mrf.mxu1  ;;  %v3151_v7 = vpop.f32.mrf.mxu0 }
 0xca2   : > { %v2163_v8 = vadd.f32 %v2159_v5, %v3432_v11 }
 0xca3   : > { %v2031_v10 = vpop.f32.mrf.mxu1 }
 0xca4   : > { %v2169_v12 = vsel %vm919_vm6, %v2163_v8, -inf }
 0xca5   : > { %2170 = vmax.xlane.f32.xlu1 %v2169_v12  ;;  %v3139_v13 = vpop.f32.mrf.mxu1 }
 0xca7   : > { %v2090_v14 = vpop.f32.mrf.mxu1 }
 0xca8   : > { %v2160_v15 = vmul.f32 0.35355338, %v2090_v14 }
 0xca9   : > { %2176 = vmax.xlane.f32.xlu1 %v2175_v27  ;;  %v3144_v16 = vpop.f32.mrf.mxu1 }
 0xcaa   : > { %v2164_v17 = vadd.f32 %v2160_v15, %v3432_v11 }
 0xcab   : > { %v2093_v18 = vpop.f32.mrf.mxu1 }
 0xcac   : > { %v2172_v19 = vsel %vm919_vm6, %v2164_v17, -inf }
 0xcad   : > { %2173 = vmax.xlane.f32.xlu0 %v2172_v19  ;;  %v3145_v20 = vpop.f32.mrf.mxu1 }
 0xd26   : > { %v2168_v21 = vpop.xlane.xlu0 %2167 }
 0xd27   : > { %v2178_v22 = vsub.f32 %v2162_v58, %v2168_v21 }
 0xd29   : > { %v2182_v23 = vmul.f32 1.442695, %v2178_v22 }
 0xd2b   : > { %3269 = vpow2.f32 %v2182_v23 }
 0xd2e   : > { %v2171_v24 = vpop.xlane.xlu1 %2170 }
 0xd2f   : > { %v2179_v25 = vsub.f32 %v2163_v8, %v2171_v24 }
 0xd31   : > { %v2184_v29 = vmul.f32 1.442695, %v2179_v25 }
 0xd32   : > { %v2177_v26 = vpop.xlane.xlu1 %2176 }
 0xd33   : > { %v2181_v28 = vsub.f32 %v2165_v9, %v2177_v26 }
 0xd35   : > { %v2188_v30 = vmul.f32 1.442695, %v2181_v28 }
 0xd36   : > { %v2174_v37 = vpop.xlane.xlu0 %2173 }
 0xd37   : > { %3271 = vpow2.f32 %v2188_v30  ;;  %v2180_v38 = vsub.f32 %v2164_v17, %v2174_v37  ;;  %v3242_v17 = vld [vmem:[%s3826_s6 + $0x10] sm:$0xff]  }
 0xd38   : > { %v3270_v31 = vpop.eup %3269  ;;  %3273 = vpow2.f32 %v2184_v29 }
 0xd39   : > { %v2190_v11 = vsel %vm919_vm6, %v3270_v31, 0.0  ;;  %v2186_v40 = vmul.f32 1.442695, %v2180_v38 }
 0xd3a   : > { %2191 = vadd.xlane.f32.xlu0 %v2190_v11 }
 0xd3b   : > { %3275 = vpow2.f32 %v2186_v40 }
 0xd44   : > { %v3272_v32 = vpop.eup %3271 }
 0xd45   : > { %v2199_v33 = vsel %vm919_vm6, %v3272_v32, 0.0  ;;  %v3274_v34 = vpop.eup %3273 }
 0xd46   : > { %2200 = vadd.xlane.f32.xlu1 %v2199_v33  ;;  %v2193_v35 = vsel %vm919_vm6, %v3274_v34, 0.0 }
 0xd48   : > { %v3276_v42 = vpop.eup %3275 }
 0xd49   : > { %v2196_v43 = vsel %vm919_vm6, %v3276_v42, 0.0 }
 0xd4a   : > { %2194 = vadd.xlane.f32.xlu1 %v2193_v35 }
 0xd50   : > { %1752 = vperm.xlu0 %3221, %v2886_v36   ;;  %v2915_v36 = vld [vmem:[%s3827_s7 + $0x1] ss:$0 sm:$0xff] }
 0xd5b   : > { %1757 = vperm.xlu1 %3222, %v2887_v39  }
 0xd5f   : > { %1762 = vperm.xlu1 %3222, %v2888_v41  }
 0xd6f   : > { %2197 = vadd.xlane.f32.xlu0 %v2196_v43 }
 0xd85   : > { %1767 = vperm.xlu0 %3221, %v2889_v44  }
 0xdc3   : > { %v2192_v45 = vpop.xlane.xlu0 %2191 }
 0xdc4   : > { %3277 = vrcp.f32 %v2192_v45 }
 0xdcb   : > { %v1753_v54 = vpop.permute.xlu0 %1752 }
 0xdcc   : > { %v1888_v57 = vadd.f32 %v3691_v52, %v1753_v54 }
 0xdce   : > { %v2210_v58 = vpack.c.bf16 %v1888_v57, %v1888_v57 }
 0xdcf   : > { %v2201_v46 = vpop.xlane.xlu1 %2200 }
 0xdd1   : > { %v3278_v47 = vpop.eup %3277 }
 0xdd2   : > { %v2206_v48 = vmul.f32 %v3278_v47, %v3270_v31 }
 0xdd3   : > { %v2195_v49 = vpop.xlane.xlu1 %2194 }
 0xdd4   : > { %3279 = vrcp.f32 %v2195_v49  ;;  %v2214_v50 = vpack.c.bf16 %v2206_v48, %v2206_v48  ;;  %v3243_v49 = vld [vmem:[%s3830_s10 + $0x18] sm:$0xff]  }
 0xdd5   : > { %3281 = vrcp.f32 %v2201_v46 }
 0xdd6   : > { %v2222_v56 = vsel %vm919_vm6, %v2214_v50, 0 }
 0xdd7   : > { %3153 = vmatpush3.bf16.xpose.msra.mxu1 %v2222_v56  ;;  %v1758_v63 = vpop.permute.xlu1 %1757 }
 0xdd8   : > { %3164 = vmatprep.subr.bf16.mxu1 %v3298_v2  ;;  %v1891_v4 = vadd.f32 %v3695_v55, %v1758_v63 }
 0xdda   : > { %v2211_v5 = vpack.c.bf16 %v1891_v4, %v1891_v4  ;;  %v2928_v4 = vld [vmem:[%s3831_s11 + $0x1] ss:$0 sm:$0xff] }
 0xddb   : > { %v1763_v27 = vpop.permute.xlu1 %1762 }
 0xddc   : > { %v1896_v15 = vadd.f32 %v3689_v51, %v1763_v27 }
 0xdde   : > { %3155 = vmatmul.mubr.msk.bf16.vlgmr.msra.gmra.mxu1 %vm919_vm6, %v2210_v58  ;;  %v2212_v16 = vpack.c.bf16 %v1896_v15, %v1896_v15  ;;  %v2921_v58 = vld [vmem:[%s3828_s8 + $0x1] ss:$0 sm:$0xff] }
 0xddf   : > { %3166 = vmatprep.mubr.msk.bf16.mxu1 %vm3299_vm0, %v3298_v2 }
 0xde1   : > { %v3280_v59 = vpop.eup %3279 }
 0xde2   : > { %v2207_v60 = vmul.f32 %v3280_v59, %v3274_v34  ;;  %v3282_v61 = vpop.eup %3281 }
 0xde3   : > { %v2209_v3 = vmul.f32 %v3282_v61, %v3272_v32 }
 0xde4   : > { %v2215_v62 = vpack.c.bf16 %v2207_v60, %v2207_v60  ;;  %v2922_v60 = vld [vmem:[%s3829_s9 + $0x1] ss:$0 sm:$0xff] }
 0xde5   : > { %v2217_v52 = vpack.c.bf16 %v2209_v3, %v2209_v3  ;;  %v3246_v3 = vld [vmem:[%s3832_s12 + $0x10] sm:$0xff]  }
 0xde6   : > { %v2268_v0 = vsel %vm919_vm6, %v2215_v62, 0 }
 0xde7   : > { %3159 = vmatpush3.bf16.xpose.msra.mxu0 %v2268_v0  ;;  %v2360_v6 = vsel %vm919_vm6, %v2217_v52, 0  ;;  %v3245_v0 = vld [vmem:[%s3832_s12 + $0x18] sm:$0xff]  }
 0xde8   : > { %3170 = vmatprep.subr.bf16.mxu0 %v3298_v2 }
 0xdee   : > { %3161 = vmatmul.mubr.msk.bf16.vlgmr.msra.gmra.mxu0 %vm919_vm6, %v2211_v5 }
 0xdef   : > { %3171 = vmatpush3.bf16.xpose.msra.mxu0 %v2360_v6  ;;  %3172 = vmatprep.mubr.msk.bf16.mxu0 %vm3299_vm0, %v3298_v2 }
 0xdf0   : > { %3184 = vmatprep.subr.bf16.mxu0 %v3298_v2 }
 0xdf8   : > { %v2198_v7 = vpop.xlane.xlu0 %2197 }
 0xdf9   : > { %3283 = vrcp.f32 %v2198_v7 }
 0xe00   : > { %v1768_v8 = vpop.permute.xlu0 %1767 }
 0xe01   : > { %v1899_v9 = vadd.f32 %v3693_v53, %v1768_v8  ;;  %v3241_v53 = vld [vmem:[%s3826_s6 + $0x18] sm:$0xff]  }
 0xe03   : > { %v2213_v55 = vpack.c.bf16 %v1899_v9, %v1899_v9 }
 0xe05   : > { %3173 = vmatmul.mubr.msk.bf16.vlgmr.msra.gmra.mxu0 %vm919_vm6, %v2213_v55 }
 0xe06   : > { %v3284_v10 = vpop.eup %3283  ;;  %3188 = vmatprep.mubr.msk.bf16.mxu0 %vm3299_vm0, %v3298_v2  ;;  %3185 = vmatpush3.bf16.msra.mxu0 %v3243_v49 }
 0xe07   : > { %v2208_v12 = vmul.f32 %v3284_v10, %v3276_v42  ;;  %3186 = vmatprep.subr.bf16.mxu0 %v3298_v2  ;;  %v2937_v10 = vld [vmem:[%s3833_s13 + $0x1] ss:$0 sm:$0xff] }
 0xe09   : > { %v2216_v13 = vpack.c.bf16 %v2208_v12, %v2208_v12 }
 0xe0b   : > { %v2314_v14 = vsel %vm919_vm6, %v2216_v13, 0 }
 0xe0c   : > { %3165 = vmatpush3.bf16.xpose.msra.mxu1 %v2314_v14 }
 0xe0d   : > { %3176 = vmatprep.subr.bf16.mxu1 %v3298_v2 }
 0xe13   : > { %3167 = vmatmul.mubr.msk.bf16.vlgmr.msra.gmra.mxu1 %vm919_vm6, %v2212_v16 }
 0xe14   : > { %3180 = vmatprep.mubr.msk.bf16.mxu1 %vm3299_vm0, %v3298_v2  ;;  %3177 = vmatpush3.bf16.msra.mxu1 %v3241_v53 }
 0xe15   : > { %3178 = vmatprep.subr.bf16.mxu1 %v3298_v2 }
 0xe18   : > { %3179 = vmatpush3.bf16.msra.mxu1 %v3242_v17 }
 0xe19   : > { %3192 = vmatprep.subr.bf16.mxu1 %v3298_v2 }
 0xe9e   : > { %v2258_v51 = vpop.f32.mrf.mxu1 }
 0xea0   : > { %v3156_v18 = vpop.f32.mrf.mxu1 }
 0xea2   : > { %v2261_v19 = vpop.f32.mrf.mxu1 }
 0xea4   : > { %v3157_v20 = vpop.f32.mrf.mxu1 }
 0xeae   : > { %v2304_v21 = vpop.f32.mrf.mxu0 }
 0xeaf   : > { %v2402_v22 = vpack.c.bf16 %v2304_v21, %v2258_v51  ;;  %v3247_v21 = vld [vmem:[%s3836_s16 + $0x8] sm:$0xff]  }
 0xeb0   : > { %v3162_v23 = vpop.f32.mrf.mxu0 }
 0xeb1   : > { %2417 = vxpose.xlu1.c.b16.start [1/2] (short) (narrow) %v2402_v22, 16  ;;  %v3248_v22 = vld [vmem:[%s3836_s16] sm:$0xff]  }
 0xeb2   : > { %v2307_v24 = vpop.f32.mrf.mxu0 }
 0xeb4   : > { %v3163_v25 = vpop.f32.mrf.mxu0 }
 0xec5   : > { %v2396_v26 = vpop.f32.mrf.mxu0 }
 0xec7   : > { %v3174_v28 = vpop.f32.mrf.mxu0 }
 0xec8   : > { %v2943_v28 = vld [vmem:[%s3834_s14 + $0x1] ss:$0 sm:$0xff] }
 0xec9   : > { %v2399_v29 = vpop.f32.mrf.mxu0 }
 0xecb   : > { %v3175_v30 = vpop.f32.mrf.mxu0 }
 0xecc   : > { %v2944_v30 = vld [vmem:[%s3835_s15 + $0x1] ss:$0 sm:$0xff] }
 0xed3   : > { %v2350_v31 = vpop.f32.mrf.mxu1 }
 0xed4   : > { %v2403_v11 = vpack.c.bf16 %v2396_v26, %v2350_v31 }
 0xed5   : > { %v3168_v32 = vpop.f32.mrf.mxu1 }
 0xed6   : > { %2418 = vxpose.xlu1.c.b16.end [2/2] (short) (narrow) %v2403_v11, 16 }
 0xed7   : > { %v2353_v33 = vpop.f32.mrf.mxu1 }
 0xed9   : > { %v3169_v34 = vpop.f32.mrf.mxu1 }
 0xf34   : > { %v2425_v35 = vpop.trf.xlu1 }
 0xf35   : > { %3181 = vmatmul.mubr.msk.bf16.vlgmr.msra.gmra.mxu1 %vm792_vm4, %v2425_v35 }
 0xf36   : > { %3196 = vmatprep.mubr.msk.bf16.mxu1 %vm3299_vm0, %v3298_v2  ;;  %3193 = vmatpush3.bf16.msra.mxu1 %v3245_v0 }
 0xf37   : > { %3194 = vmatprep.subr.bf16.mxu1 %v3298_v2 }
 0xf3a   : > { %3195 = vmatpush3.bf16.msra.mxu1 %v3246_v3 }
 0xff5   : > { %v2482_v37 = vpop.f32.mrf.mxu1 }
 0xff6   : > { %v2483_v38 = vadd.f32 %v2915_v36, %v2482_v37 }
 0xff7   : > { %v3182_v39 = vpop.f32.mrf.mxu1 }
 0xff8   : > { %v2488_v40 = vadd.f32 %v2483_v38, %v3640_v1  ;;  %v3244_v1 = vld [vmem:[%s3830_s10 + $0x10] sm:$0xff]  }
 0xff9   : > { %v2485_v41 = vpop.f32.mrf.mxu1  ;;  %3187 = vmatpush3.bf16.msra.mxu0 %v3244_v1 }
 0xffa   : > { %v2493_v42 = vsel %vm792_vm4, %v2488_v40, 0.0  ;;  %3200 = vmatprep.subr.bf16.mxu0 %v3298_v2 }
 0xffb   : > { %2494 = vadd.xlane.f32.xlu0 %v2493_v42  ;;  %v3183_v43 = vpop.f32.mrf.mxu1 }
0x1084   : > { %v2495_v44 = vpop.xlane.xlu0 %2494 }
0x1085   : > { %v2496_v45 = vmul.f32 0.03125, %v2495_v44 }
0x1087   : > { %v2497_v46 = vsub.f32 %v2488_v40, %v2496_v45 }
0x1089   : > { %v2498_v47 = vmul.f32 %v2497_v46, %v2497_v46 }
0x108b   : > { %v2499_v48 = vsel %vm792_vm4, %v2498_v47, 0.0 }
0x108c   : > { %2500 = vadd.xlane.f32.xlu0 %v2499_v48 }
0x1115   : > { %v2501_v50 = vpop.xlane.xlu0 %2500 }
0x1116   : > { %v2502_v54 = vmul.f32 0.03125, %v2501_v50 }
0x1118   : > { %v2503_v56 = vadd.f32 1e-05, %v2502_v54 }
0x111a   : > { %3285 = vrsqrt.f32 %v2503_v56 }
0x1127   : > { %v3286_v57 = vpop.eup %3285 }
0x1128   : > { %v2505_v59 = vmul.f32 %v3286_v57, %v2497_v46 }
0x112a   : > { %v2512_v61 = vmul.f32 %v2921_v58, %v2505_v59 }
0x112c   : > { %v2519_v62 = vadd.f32 %v2922_v60, %v2512_v61 }
0x112e   : > { %v2525_v63 = vpack.c.bf16 %v2519_v62, %v2519_v62 }
0x1130   : > { %3189 = vmatmul.mubr.msk.bf16.vlgmr.msra.gmra.mxu0 %vm792_vm4, %v2525_v63 }
0x1131   : > { %3204 = vmatprep.mubr.msk.bf16.mxu0 %vm3299_vm0, %v3298_v2  ;;  %3201 = vmatpush3.bf16.msra.mxu0 %v3247_v21 }
0x1132   : > { %3202 = vmatprep.subr.bf16.mxu0 %v3298_v2  ;;  %v2945_v2 = vld [vmem:[%s3837_s17] ss:$0 sm:$0xff] }
0x1135   : > { %3203 = vmatpush3.bf16.msra.mxu0 %v3248_v22 }
0x11f0   : > { %v2583_v52 = vpop.f32.mrf.mxu0 }
0x11f1   : > { %v2584_v5 = vadd.f32 %v2928_v4, %v2583_v52 }
0x11f2   : > { %v3190_v6 = vpop.f32.mrf.mxu0 }
0x11f3   : > { %v2589_v7 = vmax.f32 %v2584_v5, 0.0 }
0x11f4   : > { %v2586_v8 = vpop.f32.mrf.mxu0 }
0x11f5   : > { %v2595_v9 = vpack.c.bf16 %v2589_v7, %v2589_v7 }
0x11f6   : > { %v3191_v55 = vpop.f32.mrf.mxu0 }
0x11f7   : > { %3197 = vmatmul.mubr.msk.bf16.vlgmr.msra.gmra.mxu1 %vm792_vm4, %v2595_v9 }
0x12b7   : > { %v2653_v12 = vpop.f32.mrf.mxu1 }
0x12b8   : > { %v2654_v13 = vadd.f32 %v2937_v10, %v2653_v12 }
0x12b9   : > { %v3198_v27 = vpop.f32.mrf.mxu1 }
0x12ba   : > { %v2659_v14 = vadd.f32 %v2654_v13, %v2519_v62 }
0x12bb   : > { %v2656_v15 = vpop.f32.mrf.mxu1 }
0x12bc   : > { %v2664_v16 = vsel %vm792_vm4, %v2659_v14, 0.0 }
0x12bd   : > { %2665 = vadd.xlane.f32.xlu0 %v2664_v16  ;;  %v3199_v53 = vpop.f32.mrf.mxu1 }
0x1346   : > { %v2666_v17 = vpop.xlane.xlu0 %2665 }
0x1347   : > { %v2667_v51 = vmul.f32 0.03125, %v2666_v17 }
0x1349   : > { %v2668_v18 = vsub.f32 %v2659_v14, %v2667_v51 }
0x134b   : > { %v2669_v19 = vmul.f32 %v2668_v18, %v2668_v18 }
0x134d   : > { %v2670_v20 = vsel %vm792_vm4, %v2669_v19, 0.0 }
0x134e   : > { %2671 = vadd.xlane.f32.xlu1 %v2670_v20 }
0x13d7   : > { %v2672_v23 = vpop.xlane.xlu1 %2671 }
0x13d8   : > { %v2673_v24 = vmul.f32 0.03125, %v2672_v23 }
0x13da   : > { %v2674_v25 = vadd.f32 1e-05, %v2673_v24 }
0x13dc   : > { %3287 = vrsqrt.f32 %v2674_v25 }
0x13e9   : > { %v3288_v26 = vpop.eup %3287 }
0x13ea   : > { %v2676_v29 = vmul.f32 %v3288_v26, %v2668_v18 }
0x13ec   : > { %v2683_v31 = vmul.f32 %v2943_v28, %v2676_v29 }
0x13ee   : > { %v2690_v11 = vadd.f32 %v2944_v30, %v2683_v31 }
0x13f0   : > { %v2695_v32 = vpack.c.bf16 %v2690_v11, %v2690_v11 }
0x13f2   : > { %3205 = vmatmul.mubr.msk.bf16.vlgmr.msra.gmra.mxu0 %vm792_vm4, %v2695_v32 }
0x14b2   : > { %v2752_v33 = vpop.f32.mrf.mxu0 }
0x14b3   : > { %v2753_v34 = vadd.f32 %v2945_v2, %v2752_v33 }
0x14b4   : > { %v3206_v35 = vpop.f32.mrf.mxu0 }
0x14b5   : > { %2758 = vst [vmem:[%s584_s1] sm:$0xff] %v2753_v34 }
0x14b6   : > { %v2755_v36 = vpop.f32.mrf.mxu0 }
0x14b8   : > { %v3207_v37 = vpop.f32.mrf.mxu0 }
0x14b9 PF: > { %s28_s27 = sadd.s32 1, %s3295_s27  }
0x14ba   : > { %p25_p4 = scmp.ge.s32.totalorder %s28_s27, 4  }
0x14bc   :  { %27 = sbr.rel (!%p25_p4) target bundleno = 4 (0x4), region = 137 }

</bundles_post_ra>
